<compile_context>
chip_gen: v6e
topology: v6e:2x2x1
jax: 0.10.0
libtpu: 0.0.40
codegen_flags: <defaults>
</compile_context>

<pallas_src>
import numpy as np
import jax
import jax.numpy as jnp
from jax import lax
from jax.experimental import pallas as pl
from jax.experimental.pallas import tpu as pltpu

_LANE = 128
_TILE = 512                 # square tile side for large systems (1 MiB f32 per B block)
_TILE_BUDGET = 2 << 20      # max bytes of one B block (before double buffering)

# ReaxFF pair parameters (d0s, pbe1, pbe2) for pair types (H,H), (H,O), (O,O),
# identical to the nn.ParameterDict initial values.
REAX_PARAMS = np.array(
    [157.5488, -0.1661, 6.25,      # '001-001'
     216.7852, -1.0,    1.6492,    # '001-008'
     122.9794,  1.0,    0.1958],   # '008-008'
    dtype=np.float32)


def _blend_coeffs(params):
    """(9,) raw params -> (9,) blend coefficients [a0, a1, a2] per parameter.

    For oxygen indicators (o_i, o_j) in {0, 1}:
        value = a0 + a1 * (o_i + o_j) + a2 * o_i * o_j
    is exact at the three realizable corners (H-H, H-O, O-O).  d0 is blended in
    log space so it folds into the exponential.  Flat layout: 3*k + c with
    k in {log d0, pbe1, pbe2} and c in {a0, a1, a2}.
    """
    p = jnp.asarray(params, jnp.float32).reshape(3, 3)   # rows: HH, HO, OO
    p = p.at[:, 0].set(jnp.log(p[:, 0]))
    a0 = p[0]
    a1 = p[1] - p[0]
    a2 = p[2] + p[0] - 2.0 * p[1]
    return jnp.stack([a0, a1, a2], axis=1).reshape(9)


def _choose_tiles(NB, NA):
    """Static tiling decision: (na_pad, TB, TJ, TI)."""
    na_128 = max(_LANE, ((NA + _LANE - 1) // _LANE) * _LANE)
    if na_128 <= _TILE:
        # Small system: whole matrix per tile, several batches per grid step.
        na_pad = na_128
        per = na_pad * na_pad * 4
        tb = 1
        for d in range(NB, 0, -1):
            if NB % d == 0 and d * per <= _TILE_BUDGET:
                tb = d
                break
        return na_pad, tb, na_pad, na_pad
    # Large system: square 512x512 tiles; pad atom axes to a tile multiple so
    # every block divides evenly (no OOB reads; padded Z/B are exact zeros).
    na_pad = ((na_128 + _TILE - 1) // _TILE) * _TILE
    return na_pad, 1, _TILE, _TILE


def _make_index_maps(TJ, TI, n_jt, n_jt_s, NBg):
    """Prefetch-driven index maps with triangle / n_atoms DMA elision."""

    def effective(s, jt, it, n_ref):
        n = n_ref[0]           # n_atoms
        it_last = n_ref[1]     # ceil(n_atoms / TI) - 1 (clamped to >= 0)
        jt_g = s * n_jt_s + jt
        j0 = jt_g * TJ
        ok = jnp.logical_and(jt_g < n_jt, j0 < n)
        jt_eff = jnp.where(ok, jt_g, 0)
        lim = jnp.minimum(j0 + TJ, n)
        fresh = jnp.logical_and(ok, it * TI < lim)
        # With TJ == TI the last fresh column block of this row is
        # min(jt_g, it_last); redirecting there keeps the block index equal to
        # the previous iteration's, so the DMA is elided.
        it_eff = jnp.where(fresh, it, jnp.minimum(jt_eff, it_last))
        return jt_eff, it_eff

    def col_map(s, bb, jt, it, n_ref):
        _, it_eff = effective(s, jt, it, n_ref)
        return (bb, 0, it_eff)

    def row_map(s, bb, jt, it, n_ref):
        jt_eff, _ = effective(s, jt, it, n_ref)
        return (bb, jt_eff, 0)

    def b_map(s, bb, jt, it, n_ref):
        jt_eff, it_eff = effective(s, jt, it, n_ref)
        return (bb, jt_eff, it_eff)

    def out_map(s, bb, jt, it, n_ref):
        return (s * NBg + bb, 0, 0)

    return col_map, row_map, b_map, out_map


def _make_kernel(TJ, TI, n_jt, n_jt_s, n_it):
    def kernel(n_ref, coef_ref, col_ref, row_ref, b_ref, e_ref, acc_ref):
        s = pl.program_id(0)
        jt = pl.program_id(2)
        it = pl.program_id(3)
        n_atoms = n_ref[0]

        jt_g = s * n_jt_s + jt
        j0 = jt_g * TJ
        i0 = it * TI
        lim = jnp.minimum(j0 + TJ, n_atoms)
        do = jnp.logical_and(jnp.logical_and(jt_g < n_jt, j0 < n_atoms), i0 < lim)
        needs_tri = i0 + TI > j0    # tile touches / straddles the diagonal

        @pl.when(jnp.logical_and(jt == 0, it == 0))
        def _init():
            acc_ref[...] = jnp.zeros_like(acc_ref)

        def tile_energy(with_tri):
            o_i = col_ref[:, 0:1, :]            # (TB, 1, TI)  iatom oxygen indicator
            v_i = col_ref[:, 1:2, :]            # (TB, 1, TI)  iatom validity
            o_j = row_ref[:, :, 0:1]            # (TB, TJ, 1)  jatom oxygen indicator
            v_j = row_ref[:, :, 1:2]            # (TB, TJ, 1)  jatom validity (incl. j<n)

            # Rank-1 factored blend:  blend = (a0 + a1*o_i) + o_j*(a1 + a2*o_i).
            def uv(k):
                a0 = coef_ref[3 * k + 0]
                a1 = coef_ref[3 * k + 1]
                a2 = coef_ref[3 * k + 2]
                return a0 + a1 * o_i, a1 + a2 * o_i

            u_ld, w_ld = uv(0)                  # log(d0)
            u_p1, w_p1 = uv(1)                  # pbe1
            u_p2, w_p2 = uv(2)                  # pbe2
            log_d0 = u_ld + o_j * w_ld          # (TB, TJ, TI)
            pbe1 = u_p1 + o_j * w_p1
            pbe2 = u_p2 + o_j * w_p2

            # Column validity folded into bij (zero columns -> zero energy).
            bij = jnp.abs(b_ref[...]) * v_i
            # bij ** pbe2 via exp/log; bij == 0 is forced to 0 by the leading
            # bij factor (matches the reference for pbe2 > 0).
            powv = jnp.exp(pbe2 * jnp.log(jnp.maximum(bij, 1e-30)))
            e = bij * jnp.exp(log_d0 + pbe1 * (1.0 - powv))
            e = e * v_j                          # row validity (includes j < n_atoms)
            if with_tri:
                # Strict upper triangle i < j (which also implies i < n_atoms).
                i_g = i0 + lax.broadcasted_iota(jnp.int32, (1, TJ, TI), 2)
                j_g = j0 + lax.broadcasted_iota(jnp.int32, (1, TJ, TI), 1)
                e = jnp.where(i_g < j_g, e, 0.0)
            # Sublane (jatom-axis) partial reduce into the lane-dense accumulator;
            # the cross-lane reduce is deferred to the final step.
            acc_ref[...] += jnp.sum(e, axis=1, keepdims=True)

        @pl.when(jnp.logical_and(do, needs_tri))
        def _diag():
            tile_energy(True)

        @pl.when(jnp.logical_and(do, jnp.logical_not(needs_tri)))
        def _interior():
            tile_energy(False)

        @pl.when(jnp.logical_and(jt == n_jt_s - 1, it == n_it - 1))
        def _finalize():
            e_ref[...] = -jnp.sum(acc_ref[...], axis=2, keepdims=True)

    return kernel


@jax.jit
def reax_bond_energy(Z, B, params):
    NB, NA = Z.shape
    Z = Z.astype(jnp.int32)
    B = B.astype(jnp.float32)

    # n_atoms is defined from Z[0] only — exactly like the PyTorch forward.
    n_atoms = jnp.sum(Z[0] != 0).astype(jnp.int32)

    na_pad, TB, TJ, TI = _choose_tiles(NB, NA)
    NBg = NB // TB
    n_jt = na_pad // TJ
    n_it = na_pad // TI
    # Core-split for single-group workloads (v7x has 2 TensorCores per chip).
    n_split = 2 if (NBg == 1 and n_jt >= 2) else 1
    n_jt_s = pl.cdiv(n_jt, n_split)

    if na_pad != NA:
        Z = jnp.pad(Z, ((0, 0), (0, na_pad - NA)))
        B = jnp.pad(B, ((0, 0), (0, na_pad - NA), (0, na_pad - NA)))

    # Per-atom oxygen / validity indicators as lane-dense f32 (no int compares
    # or j-index iota inside the kernel).  Validity already carries the
    # positional j < n_atoms cutoff.
    idx = jnp.arange(na_pad, dtype=jnp.int32)
    valid = jnp.logical_and(Z != 0, idx[None, :] < n_atoms).astype(jnp.float32)
    oxy = (Z == 8).astype(jnp.float32)
    col_pack = jnp.stack([oxy, valid], axis=1)     # (NB, 2, na_pad)  iatom data
    row_pack = jnp.stack([oxy, valid], axis=2)     # (NB, na_pad, 2)  jatom data

    coeffs = _blend_coeffs(params)
    it_last = jnp.maximum((n_atoms + TI - 1) // TI - 1, 0).astype(jnp.int32)
    n_info = jnp.stack([n_atoms, it_last]).astype(jnp.int32)

    col_map, row_map, b_map, out_map = _make_index_maps(TJ, TI, n_jt, n_jt_s, NBg)
    kernel = _make_kernel(TJ, TI, n_jt, n_jt_s, n_it)

    grid_spec = pltpu.PrefetchScalarGridSpec(
        num_scalar_prefetch=1,
        grid=(n_split, NBg, n_jt_s, n_it),
        in_specs=[
            pl.BlockSpec(memory_space=pltpu.MemorySpace.SMEM),     # coeffs (9,)
            pl.BlockSpec((TB, 2, TI), col_map),                    # column indicators
            pl.BlockSpec((TB, TJ, 2), row_map),                    # row indicators
            pl.BlockSpec((TB, TJ, TI), b_map),                     # B tile
        ],
        out_specs=pl.BlockSpec((TB, 1, 1), out_map),
        scratch_shapes=[pltpu.VMEM((TB, 1, TI), jnp.float32)],
    )

    cost = pl.CostEstimate(
        flops=16 * NB * na_pad * na_pad // 2,
        transcendentals=3 * NB * na_pad * na_pad // 2,
        bytes_accessed=4 * NB * na_pad * na_pad // 2 + 16 * NB * na_pad,
    )

    out = pl.pallas_call(
        kernel,
        out_shape=jax.ShapeDtypeStruct((n_split * NB, 1, 1), jnp.float32),
        grid_spec=grid_spec,
        compiler_params=pltpu.CompilerParams(
            dimension_semantics=("parallel", "parallel", "arbitrary", "arbitrary"),
            vmem_limit_bytes=32 * 1024 * 1024,
        ),
        cost_estimate=cost,
    )(n_info, coeffs, col_pack, row_pack, B)

    # Sum the per-split partial energies.
    return jnp.sum(out.reshape(n_split, NB), axis=0).reshape(NB, 1)


def reaxml_forward(data):
    # TODO(synk): the `chgbond` MPNN submodule's class is not provided in the
    # reference source, so its outputs (R, Z, N, Ai, Pij, D) are taken directly
    # as inputs here instead of being recomputed.  (Q and D are read but unused
    # in E, exactly as in the PyTorch forward.)
    R, Z, N = data['R'], data['Z'], data['N']
    Q, B, D = data['Ai'], data['Pij'], data['D']
    params = jnp.asarray(REAX_PARAMS)
    E = reax_bond_energy(Z, B, params)
    return {'R': R, 'Z': Z, 'N': N, 'E': E, 'Q': Q, 'B': B, 'D': D}


def _reference_energy(Z, B):
    """Pure NumPy double-precision re-implementation of the PyTorch loops."""
    Z = np.asarray(Z)
    B = np.asarray(B, dtype=np.float64)
    NB, _ = Z.shape
    n_atoms = int(np.sum(Z[0] != 0))
    table = {
        (1, 1): (157.5488, -0.1661, 6.25),
        (1, 8): (216.7852, -1.0, 1.6492),
        (8, 8): (122.9794, 1.0, 0.1958),
    }
    E = np.zeros((NB, 1), dtype=np.float64)
    for b in range(NB):
        for i in range(n_atoms - 1):
            for j in range(i + 1, n_atoms):
                zi, zj = int(Z[b, i]), int(Z[b, j])
                if zi * zj == 0:
                    continue
                d0, p1, p2 = table[tuple(sorted((zi, zj)))]
                bij = abs(float(B[b, j, i]))
                E[b, 0] += -d0 * bij * np.exp(p1 * (1.0 - bij ** p2))
    return E


if __name__ == "__main__":
    key = jax.random.PRNGKey(0)
    k1, k2, k3, k4, k5 = jax.random.split(key, 5)

    # ---- Test 1: small molecule batch (whole-matrix tile, multi-batch blocking) ----
    NB, NA = 2, 16
    n_real = 8
    Zh = np.zeros((NB, NA), dtype=np.int32)
    Zh[0, :n_real] = [8, 1, 1, 8, 1, 1, 8, 1]
    Zh[1, :n_real] = [8, 1, 1, 0, 1, 1, 0, 1]   # padded atoms inside the window
    Z = jnp.asarray(Zh)
    B = jax.random.uniform(k1, (NB, NA, NA), jnp.float32, -1.0, 1.0)   # bond orders Pij
    D = jax.random.uniform(k2, (NB, NA, NA), jnp.float32, 0.5, 5.0)    # distances
    Q = jax.random.normal(k3, (NB, NA), jnp.float32)                   # charges Ai
    R = jax.random.normal(k4, (NB, NA, 3), jnp.float32)                # positions
    N = jnp.full((NB,), n_real, dtype=jnp.int32)

    data = {'R': R, 'Z': Z, 'N': N, 'Ai': Q, 'Pij': B, 'D': D}
    out = reaxml_forward(data)
    E1 = np.asarray(jax.block_until_ready(out['E']), dtype=np.float64)
    E1_ref = _reference_energy(Z, B)
    if not np.allclose(E1, E1_ref, rtol=1e-3, atol=1e-2):
        raise AssertionError(f"test1 mismatch: kernel={E1} ref={E1_ref}")

    # ---- Test 2: larger single molecule (triangular tiling + core-split path) ----
    NB2, NA2 = 1, 520
    Zh2 = np.where(np.arange(NA2) % 3 == 0, 8, 1).astype(np.int32)[None, :]
    Zh2 = Zh2.copy()
    Zh2[0, 100] = 0
    Zh2[0, 300] = 0
    Z2 = jnp.asarray(Zh2)
    B2 = jax.random.uniform(k5, (NB2, NA2, NA2), jnp.float32, -1.0, 1.0)
    E2 = np.asarray(
        jax.block_until_ready(reax_bond_energy(Z2, B2, jnp.asarray(REAX_PARAMS))),
        dtype=np.float64)
    E2_ref = _reference_energy(Z2, B2)
    if not np.allclose(E2, E2_ref, rtol=1e-3, atol=1e-2):
        raise AssertionError(f"test2 mismatch: kernel={E2} ref={E2_ref}")

    print("KERNEL_OK")
</pallas_src>

<mosaic_0001>
module attributes {stable_mosaic.version = 11 : i64} {
  func.func @kernel(%arg0: i32, %arg1: i32, %arg2: i32, %arg3: i32, %arg4: memref<2xi32, #tpu.memory_space<smem>>, %arg5: memref<9xf32, #tpu.memory_space<smem>>, %arg6: memref<2x2x128xf32, #tpu.memory_space<vmem>>, %arg7: memref<2x128x2xf32, #tpu.memory_space<vmem>>, %arg8: memref<2x128x128xf32, #tpu.memory_space<vmem>>, %arg9: memref<2x1x1xf32, #tpu.memory_space<vmem>>, %arg10: memref<2x1x128xf32, #tpu.memory_space<vmem>>) attributes {dimension_semantics = [#tpu.dimension_semantics<parallel>, #tpu.dimension_semantics<parallel>, #tpu.dimension_semantics<arbitrary>, #tpu.dimension_semantics<arbitrary>], iteration_bounds = array<i64: 1, 1, 1, 1>, scalar_prefetch = 1 : i64, scratch_operands = 1 : i64, tpu.core_type = #tpu.core_type<tc>, window_params = [{transform_indices = @transform_0, window_bounds = array<i64: 9>}, {transform_indices = @transform_1, window_bounds = array<i64: 2, 2, 128>}, {transform_indices = @transform_2, window_bounds = array<i64: 2, 128, 2>}, {transform_indices = @transform_3, window_bounds = array<i64: 2, 128, 128>}, {transform_indices = @transform_4, window_bounds = array<i64: 2, 1, 1>}]} {
    %c0 = arith.constant 0 : index
    %0 = memref.load %arg4[%c0] : memref<2xi32, #tpu.memory_space<smem>>
    %c1_i32 = arith.constant 1 : i32
    %1 = arith.muli %arg0, %c1_i32 : i32
    %2 = arith.addi %1, %arg2 : i32
    %c128_i32 = arith.constant 128 : i32
    %3 = arith.muli %2, %c128_i32 : i32
    %c128_i32_0 = arith.constant 128 : i32
    %4 = arith.muli %arg3, %c128_i32_0 : i32
    %c128_i32_1 = arith.constant 128 : i32
    %5 = arith.addi %3, %c128_i32_1 : i32
    %6 = arith.minsi %5, %0 : i32
    %c1_i32_2 = arith.constant 1 : i32
    %7 = arith.cmpi slt, %2, %c1_i32_2 : i32
    %8 = arith.cmpi slt, %3, %0 : i32
    %9 = arith.andi %7, %8 : i1
    %10 = arith.cmpi slt, %4, %6 : i32
    %11 = arith.andi %9, %10 : i1
    %c128_i32_3 = arith.constant 128 : i32
    %12 = arith.addi %4, %c128_i32_3 : i32
    %13 = arith.cmpi sgt, %12, %3 : i32
    %c0_i32 = arith.constant 0 : i32
    %14 = arith.cmpi eq, %arg2, %c0_i32 : i32
    %c0_i32_4 = arith.constant 0 : i32
    %15 = arith.cmpi eq, %arg3, %c0_i32_4 : i32
    %16 = arith.andi %14, %15 : i1
    %17 = arith.extui %16 : i1 to i32
    %c0_i32_5 = arith.constant 0 : i32
    %18 = arith.cmpi ne, %17, %c0_i32_5 : i32
    scf.if %18 {
      %cst = arith.constant 0.000000e+00 : f32
      %31 = vector.broadcast %cst : f32 to vector<2x1x128xf32>
      %c0_11 = arith.constant 0 : index
      %c0_12 = arith.constant 0 : index
      %c0_13 = arith.constant 0 : index
      %32 = vector.load %arg10[%c0_11, %c0_12, %c0_13] : memref<2x1x128xf32, #tpu.memory_space<vmem>>, vector<2x1x128xf32>
      tpu.vector_store %arg10[%c0_11, %c0_12, %c0_13], %31 {strides = array<i32>} : memref<2x1x128xf32, #tpu.memory_space<vmem>>, vector<2x1x128xf32>,
    } else {
    }
    %19 = arith.andi %11, %13 : i1
    %20 = arith.extui %19 : i1 to i32
    %c0_i32_6 = arith.constant 0 : i32
    %21 = arith.cmpi ne, %20, %c0_i32_6 : i32
    scf.if %21 {
      %c0_11 = arith.constant 0 : index
      %c0_12 = arith.constant 0 : index
      %c0_13 = arith.constant 0 : index
      %31 = vector.load %arg6[%c0_11, %c0_12, %c0_13] : memref<2x2x128xf32, #tpu.memory_space<vmem>>, vector<2x1x128xf32>
      %c0_14 = arith.constant 0 : index
      %c1 = arith.constant 1 : index
      %c0_15 = arith.constant 0 : index
      %32 = vector.load %arg6[%c0_14, %c1, %c0_15] : memref<2x2x128xf32, #tpu.memory_space<vmem>>, vector<2x1x128xf32>
      %c0_16 = arith.constant 0 : index
      %c0_17 = arith.constant 0 : index
      %c0_18 = arith.constant 0 : index
      %33 = vector.load %arg7[%c0_16, %c0_17, %c0_18] : memref<2x128x2xf32, #tpu.memory_space<vmem>>, vector<2x128x1xf32>
      %c0_19 = arith.constant 0 : index
      %c0_20 = arith.constant 0 : index
      %c1_21 = arith.constant 1 : index
      %34 = vector.load %arg7[%c0_19, %c0_20, %c1_21] : memref<2x128x2xf32, #tpu.memory_space<vmem>>, vector<2x128x1xf32>
      %c0_22 = arith.constant 0 : index
      %35 = memref.load %arg5[%c0_22] : memref<9xf32, #tpu.memory_space<smem>>
      %c1_23 = arith.constant 1 : index
      %36 = memref.load %arg5[%c1_23] : memref<9xf32, #tpu.memory_space<smem>>
      %c2 = arith.constant 2 : index
      %37 = memref.load %arg5[%c2] : memref<9xf32, #tpu.memory_space<smem>>
      %38 = vector.broadcast %36 : f32 to vector<2x1x128xf32>
      %39 = arith.mulf %38, %31 : vector<2x1x128xf32>
      %40 = vector.broadcast %35 : f32 to vector<2x1x128xf32>
      %41 = arith.addf %40, %39 : vector<2x1x128xf32>
      %42 = vector.broadcast %37 : f32 to vector<2x1x128xf32>
      %43 = arith.mulf %42, %31 : vector<2x1x128xf32>
      %44 = vector.broadcast %36 : f32 to vector<2x1x128xf32>
      %45 = arith.addf %44, %43 : vector<2x1x128xf32>
      %c3 = arith.constant 3 : index
      %46 = memref.load %arg5[%c3] : memref<9xf32, #tpu.memory_space<smem>>
      %c4 = arith.constant 4 : index
      %47 = memref.load %arg5[%c4] : memref<9xf32, #tpu.memory_space<smem>>
      %c5 = arith.constant 5 : index
      %48 = memref.load %arg5[%c5] : memref<9xf32, #tpu.memory_space<smem>>
      %49 = vector.broadcast %47 : f32 to vector<2x1x128xf32>
      %50 = arith.mulf %49, %31 : vector<2x1x128xf32>
      %51 = vector.broadcast %46 : f32 to vector<2x1x128xf32>
      %52 = arith.addf %51, %50 : vector<2x1x128xf32>
      %53 = vector.broadcast %48 : f32 to vector<2x1x128xf32>
      %54 = arith.mulf %53, %31 : vector<2x1x128xf32>
      %55 = vector.broadcast %47 : f32 to vector<2x1x128xf32>
      %56 = arith.addf %55, %54 : vector<2x1x128xf32>
      %c6 = arith.constant 6 : index
      %57 = memref.load %arg5[%c6] : memref<9xf32, #tpu.memory_space<smem>>
      %c7 = arith.constant 7 : index
      %58 = memref.load %arg5[%c7] : memref<9xf32, #tpu.memory_space<smem>>
      %c8 = arith.constant 8 : index
      %59 = memref.load %arg5[%c8] : memref<9xf32, #tpu.memory_space<smem>>
      %60 = vector.broadcast %58 : f32 to vector<2x1x128xf32>
      %61 = arith.mulf %60, %31 : vector<2x1x128xf32>
      %62 = vector.broadcast %57 : f32 to vector<2x1x128xf32>
      %63 = arith.addf %62, %61 : vector<2x1x128xf32>
      %64 = vector.broadcast %59 : f32 to vector<2x1x128xf32>
      %65 = arith.mulf %64, %31 : vector<2x1x128xf32>
      %66 = vector.broadcast %58 : f32 to vector<2x1x128xf32>
      %67 = arith.addf %66, %65 : vector<2x1x128xf32>
      %68 = vector.broadcast %33 : vector<2x128x1xf32> to vector<2x128x128xf32>
      %69 = vector.broadcast %45 : vector<2x1x128xf32> to vector<2x128x128xf32>
      %70 = arith.mulf %68, %69 : vector<2x128x128xf32>
      %71 = vector.broadcast %41 : vector<2x1x128xf32> to vector<2x128x128xf32>
      %72 = arith.addf %71, %70 : vector<2x128x128xf32>
      %73 = vector.broadcast %33 : vector<2x128x1xf32> to vector<2x128x128xf32>
      %74 = vector.broadcast %56 : vector<2x1x128xf32> to vector<2x128x128xf32>
      %75 = arith.mulf %73, %74 : vector<2x128x128xf32>
      %76 = vector.broadcast %52 : vector<2x1x128xf32> to vector<2x128x128xf32>
      %77 = arith.addf %76, %75 : vector<2x128x128xf32>
      %78 = vector.broadcast %33 : vector<2x128x1xf32> to vector<2x128x128xf32>
      %79 = vector.broadcast %67 : vector<2x1x128xf32> to vector<2x128x128xf32>
      %80 = arith.mulf %78, %79 : vector<2x128x128xf32>
      %81 = vector.broadcast %63 : vector<2x1x128xf32> to vector<2x128x128xf32>
      %82 = arith.addf %81, %80 : vector<2x128x128xf32>
      %c0_24 = arith.constant 0 : index
      %c0_25 = arith.constant 0 : index
      %c0_26 = arith.constant 0 : index
      %83 = vector.load %arg8[%c0_24, %c0_25, %c0_26] : memref<2x128x128xf32, #tpu.memory_space<vmem>>, vector<2x128x128xf32>
      %84 = math.absf %83 : vector<2x128x128xf32>
      %85 = vector.broadcast %32 : vector<2x1x128xf32> to vector<2x128x128xf32>
      %86 = arith.mulf %84, %85 : vector<2x128x128xf32>
      %cst = arith.constant 1.000000e-30 : f32
      %87 = vector.broadcast %cst : f32 to vector<2x128x128xf32>
      %88 = arith.maximumf %86, %87 : vector<2x128x128xf32>
      %89 = math.log %88 : vector<2x128x128xf32>
      %90 = arith.mulf %82, %89 : vector<2x128x128xf32>
      %91 = math.exp %90 : vector<2x128x128xf32>
      %cst_27 = arith.constant 1.000000e+00 : f32
      %92 = vector.broadcast %cst_27 : f32 to vector<2x128x128xf32>
      %93 = arith.subf %92, %91 : vector<2x128x128xf32>
      %94 = arith.mulf %77, %93 : vector<2x128x128xf32>
      %95 = arith.addf %72, %94 : vector<2x128x128xf32>
      %96 = math.exp %95 : vector<2x128x128xf32>
      %97 = arith.mulf %86, %96 : vector<2x128x128xf32>
      %98 = vector.broadcast %34 : vector<2x128x1xf32> to vector<2x128x128xf32>
      %99 = arith.mulf %97, %98 : vector<2x128x128xf32>
      %100 = tpu.iota {dimensions = array<i32: 2>} : vector<1x128x128xi32>
      %101 = vector.broadcast %4 : i32 to vector<1x128x128xi32>
      %102 = arith.addi %101, %100 : vector<1x128x128xi32>
      %103 = tpu.iota {dimensions = array<i32: 1>} : vector<1x128x128xi32>
      %104 = vector.broadcast %3 : i32 to vector<1x128x128xi32>
      %105 = arith.addi %104, %103 : vector<1x128x128xi32>
      %106 = arith.cmpi slt, %102, %105 : vector<1x128x128xi32>
      %cst_28 = arith.constant 0.000000e+00 : f32
      %107 = vector.shape_cast %106 : vector<1x128x128xi1> to vector<1x128x128xi1>
      %108 = vector.broadcast %107 : vector<1x128x128xi1> to vector<2x128x128xi1>
      %109 = vector.broadcast %cst_28 : f32 to vector<2x128x128xf32>
      %110 = arith.select %108, %99, %109 : vector<2x128x128xi1>, vector<2x128x128xf32>
      %c0_29 = arith.constant 0 : index
      %c0_30 = arith.constant 0 : index
      %c0_31 = arith.constant 0 : index
      %111 = vector.load %arg10[%c0_29, %c0_30, %c0_31] : memref<2x1x128xf32, #tpu.memory_space<vmem>>, vector<2x1x128xf32>
      %cst_32 = arith.constant dense<0.000000e+00> : vector<2x128xf32>
      %112 = vector.multi_reduction <add>, %110, %cst_32 [1] : vector<2x128x128xf32> to vector<2x128xf32>
      %113 = vector.shape_cast %112 : vector<2x128xf32> to vector<2x1x128xf32>
      %114 = arith.addf %111, %113 : vector<2x1x128xf32>
      %c0_33 = arith.constant 0 : index
      %c0_34 = arith.constant 0 : index
      %c0_35 = arith.constant 0 : index
      %115 = vector.load %arg10[%c0_33, %c0_34, %c0_35] : memref<2x1x128xf32, #tpu.memory_space<vmem>>, vector<2x1x128xf32>
      tpu.vector_store %arg10[%c0_33, %c0_34, %c0_35], %114 {strides = array<i32>} : memref<2x1x128xf32, #tpu.memory_space<vmem>>, vector<2x1x128xf32>,
    } else {
    }
    %true = arith.constant true
    %22 = arith.xori %13, %true : i1
    %23 = arith.andi %11, %22 : i1
    %24 = arith.extui %23 : i1 to i32
    %c0_i32_7 = arith.constant 0 : i32
    %25 = arith.cmpi ne, %24, %c0_i32_7 : i32
    scf.if %25 {
      %c0_11 = arith.constant 0 : index
      %c0_12 = arith.constant 0 : index
      %c0_13 = arith.constant 0 : index
      %31 = vector.load %arg6[%c0_11, %c0_12, %c0_13] : memref<2x2x128xf32, #tpu.memory_space<vmem>>, vector<2x1x128xf32>
      %c0_14 = arith.constant 0 : index
      %c1 = arith.constant 1 : index
      %c0_15 = arith.constant 0 : index
      %32 = vector.load %arg6[%c0_14, %c1, %c0_15] : memref<2x2x128xf32, #tpu.memory_space<vmem>>, vector<2x1x128xf32>
      %c0_16 = arith.constant 0 : index
      %c0_17 = arith.constant 0 : index
      %c0_18 = arith.constant 0 : index
      %33 = vector.load %arg7[%c0_16, %c0_17, %c0_18] : memref<2x128x2xf32, #tpu.memory_space<vmem>>, vector<2x128x1xf32>
      %c0_19 = arith.constant 0 : index
      %c0_20 = arith.constant 0 : index
      %c1_21 = arith.constant 1 : index
      %34 = vector.load %arg7[%c0_19, %c0_20, %c1_21] : memref<2x128x2xf32, #tpu.memory_space<vmem>>, vector<2x128x1xf32>
      %c0_22 = arith.constant 0 : index
      %35 = memref.load %arg5[%c0_22] : memref<9xf32, #tpu.memory_space<smem>>
      %c1_23 = arith.constant 1 : index
      %36 = memref.load %arg5[%c1_23] : memref<9xf32, #tpu.memory_space<smem>>
      %c2 = arith.constant 2 : index
      %37 = memref.load %arg5[%c2] : memref<9xf32, #tpu.memory_space<smem>>
      %38 = vector.broadcast %36 : f32 to vector<2x1x128xf32>
      %39 = arith.mulf %38, %31 : vector<2x1x128xf32>
      %40 = vector.broadcast %35 : f32 to vector<2x1x128xf32>
      %41 = arith.addf %40, %39 : vector<2x1x128xf32>
      %42 = vector.broadcast %37 : f32 to vector<2x1x128xf32>
      %43 = arith.mulf %42, %31 : vector<2x1x128xf32>
      %44 = vector.broadcast %36 : f32 to vector<2x1x128xf32>
      %45 = arith.addf %44, %43 : vector<2x1x128xf32>
      %c3 = arith.constant 3 : index
      %46 = memref.load %arg5[%c3] : memref<9xf32, #tpu.memory_space<smem>>
      %c4 = arith.constant 4 : index
      %47 = memref.load %arg5[%c4] : memref<9xf32, #tpu.memory_space<smem>>
      %c5 = arith.constant 5 : index
      %48 = memref.load %arg5[%c5] : memref<9xf32, #tpu.memory_space<smem>>
      %49 = vector.broadcast %47 : f32 to vector<2x1x128xf32>
      %50 = arith.mulf %49, %31 : vector<2x1x128xf32>
      %51 = vector.broadcast %46 : f32 to vector<2x1x128xf32>
      %52 = arith.addf %51, %50 : vector<2x1x128xf32>
      %53 = vector.broadcast %48 : f32 to vector<2x1x128xf32>
      %54 = arith.mulf %53, %31 : vector<2x1x128xf32>
      %55 = vector.broadcast %47 : f32 to vector<2x1x128xf32>
      %56 = arith.addf %55, %54 : vector<2x1x128xf32>
      %c6 = arith.constant 6 : index
      %57 = memref.load %arg5[%c6] : memref<9xf32, #tpu.memory_space<smem>>
      %c7 = arith.constant 7 : index
      %58 = memref.load %arg5[%c7] : memref<9xf32, #tpu.memory_space<smem>>
      %c8 = arith.constant 8 : index
      %59 = memref.load %arg5[%c8] : memref<9xf32, #tpu.memory_space<smem>>
      %60 = vector.broadcast %58 : f32 to vector<2x1x128xf32>
      %61 = arith.mulf %60, %31 : vector<2x1x128xf32>
      %62 = vector.broadcast %57 : f32 to vector<2x1x128xf32>
      %63 = arith.addf %62, %61 : vector<2x1x128xf32>
      %64 = vector.broadcast %59 : f32 to vector<2x1x128xf32>
      %65 = arith.mulf %64, %31 : vector<2x1x128xf32>
      %66 = vector.broadcast %58 : f32 to vector<2x1x128xf32>
      %67 = arith.addf %66, %65 : vector<2x1x128xf32>
      %68 = vector.broadcast %33 : vector<2x128x1xf32> to vector<2x128x128xf32>
      %69 = vector.broadcast %45 : vector<2x1x128xf32> to vector<2x128x128xf32>
      %70 = arith.mulf %68, %69 : vector<2x128x128xf32>
      %71 = vector.broadcast %41 : vector<2x1x128xf32> to vector<2x128x128xf32>
      %72 = arith.addf %71, %70 : vector<2x128x128xf32>
      %73 = vector.broadcast %33 : vector<2x128x1xf32> to vector<2x128x128xf32>
      %74 = vector.broadcast %56 : vector<2x1x128xf32> to vector<2x128x128xf32>
      %75 = arith.mulf %73, %74 : vector<2x128x128xf32>
      %76 = vector.broadcast %52 : vector<2x1x128xf32> to vector<2x128x128xf32>
      %77 = arith.addf %76, %75 : vector<2x128x128xf32>
      %78 = vector.broadcast %33 : vector<2x128x1xf32> to vector<2x128x128xf32>
      %79 = vector.broadcast %67 : vector<2x1x128xf32> to vector<2x128x128xf32>
      %80 = arith.mulf %78, %79 : vector<2x128x128xf32>
      %81 = vector.broadcast %63 : vector<2x1x128xf32> to vector<2x128x128xf32>
      %82 = arith.addf %81, %80 : vector<2x128x128xf32>
      %c0_24 = arith.constant 0 : index
      %c0_25 = arith.constant 0 : index
      %c0_26 = arith.constant 0 : index
      %83 = vector.load %arg8[%c0_24, %c0_25, %c0_26] : memref<2x128x128xf32, #tpu.memory_space<vmem>>, vector<2x128x128xf32>
      %84 = math.absf %83 : vector<2x128x128xf32>
      %85 = vector.broadcast %32 : vector<2x1x128xf32> to vector<2x128x128xf32>
      %86 = arith.mulf %84, %85 : vector<2x128x128xf32>
      %cst = arith.constant 1.000000e-30 : f32
      %87 = vector.broadcast %cst : f32 to vector<2x128x128xf32>
      %88 = arith.maximumf %86, %87 : vector<2x128x128xf32>
      %89 = math.log %88 : vector<2x128x128xf32>
      %90 = arith.mulf %82, %89 : vector<2x128x128xf32>
      %91 = math.exp %90 : vector<2x128x128xf32>
      %cst_27 = arith.constant 1.000000e+00 : f32
      %92 = vector.broadcast %cst_27 : f32 to vector<2x128x128xf32>
      %93 = arith.subf %92, %91 : vector<2x128x128xf32>
      %94 = arith.mulf %77, %93 : vector<2x128x128xf32>
      %95 = arith.addf %72, %94 : vector<2x128x128xf32>
      %96 = math.exp %95 : vector<2x128x128xf32>
      %97 = arith.mulf %86, %96 : vector<2x128x128xf32>
      %98 = vector.broadcast %34 : vector<2x128x1xf32> to vector<2x128x128xf32>
      %99 = arith.mulf %97, %98 : vector<2x128x128xf32>
      %c0_28 = arith.constant 0 : index
      %c0_29 = arith.constant 0 : index
      %c0_30 = arith.constant 0 : index
      %100 = vector.load %arg10[%c0_28, %c0_29, %c0_30] : memref<2x1x128xf32, #tpu.memory_space<vmem>>, vector<2x1x128xf32>
      %cst_31 = arith.constant dense<0.000000e+00> : vector<2x128xf32>
      %101 = vector.multi_reduction <add>, %99, %cst_31 [1] : vector<2x128x128xf32> to vector<2x128xf32>
      %102 = vector.shape_cast %101 : vector<2x128xf32> to vector<2x1x128xf32>
      %103 = arith.addf %100, %102 : vector<2x1x128xf32>
      %c0_32 = arith.constant 0 : index
      %c0_33 = arith.constant 0 : index
      %c0_34 = arith.constant 0 : index
      %104 = vector.load %arg10[%c0_32, %c0_33, %c0_34] : memref<2x1x128xf32, #tpu.memory_space<vmem>>, vector<2x1x128xf32>
      tpu.vector_store %arg10[%c0_32, %c0_33, %c0_34], %103 {strides = array<i32>} : memref<2x1x128xf32, #tpu.memory_space<vmem>>, vector<2x1x128xf32>,
    } else {
    }
    %c0_i32_8 = arith.constant 0 : i32
    %26 = arith.cmpi eq, %arg2, %c0_i32_8 : i32
    %c0_i32_9 = arith.constant 0 : i32
    %27 = arith.cmpi eq, %arg3, %c0_i32_9 : i32
    %28 = arith.andi %26, %27 : i1
    %29 = arith.extui %28 : i1 to i32
    %c0_i32_10 = arith.constant 0 : i32
    %30 = arith.cmpi ne, %29, %c0_i32_10 : i32
    scf.if %30 {
      %c0_11 = arith.constant 0 : index
      %c0_12 = arith.constant 0 : index
      %c0_13 = arith.constant 0 : index
      %31 = vector.load %arg10[%c0_11, %c0_12, %c0_13] : memref<2x1x128xf32, #tpu.memory_space<vmem>>, vector<2x1x128xf32>
      %cst = arith.constant dense<0.000000e+00> : vector<2x1xf32>
      %32 = vector.multi_reduction <add>, %31, %cst [2] : vector<2x1x128xf32> to vector<2x1xf32>
      %33 = vector.shape_cast %32 : vector<2x1xf32> to vector<2x1x1xf32>
      %cst_14 = arith.constant 0.000000e+00 : f32
      %34 = vector.broadcast %cst_14 : f32 to vector<2x1x1xf32>
      %35 = arith.subf %34, %33 : vector<2x1x1xf32>
      %c0_15 = arith.constant 0 : index
      %c0_16 = arith.constant 0 : index
      %c0_17 = arith.constant 0 : index
      %36 = vector.load %arg9[%c0_15, %c0_16, %c0_17] : memref<2x1x1xf32, #tpu.memory_space<vmem>>, vector<2x1x1xf32>
      tpu.vector_store %arg9[%c0_15, %c0_16, %c0_17], %35 {strides = array<i32>} : memref<2x1x1xf32, #tpu.memory_space<vmem>>, vector<2x1x1xf32>,
    } else {
    }
    return
  }
  func.func @transform_0(%arg0: i32, %arg1: i32, %arg2: i32, %arg3: i32, %arg4: memref<2xi32, #tpu.memory_space<smem>>) -> i32 {
    %c0_i32 = arith.constant 0 : i32
    %c0_i32_0 = arith.constant 0 : i32
    return %c0_i32 : i32
  }
  func.func @transform_1(%arg0: i32, %arg1: i32, %arg2: i32, %arg3: i32, %arg4: memref<2xi32, #tpu.memory_space<smem>>) -> (i32, i32, i32) {
    %c0 = arith.constant 0 : index
    %0 = memref.load %arg4[%c0] : memref<2xi32, #tpu.memory_space<smem>>
    %c1 = arith.constant 1 : index
    %1 = memref.load %arg4[%c1] : memref<2xi32, #tpu.memory_space<smem>>
    %c1_i32 = arith.constant 1 : i32
    %2 = arith.muli %arg0, %c1_i32 : i32
    %3 = arith.addi %2, %arg2 : i32
    %c128_i32 = arith.constant 128 : i32
    %4 = arith.muli %3, %c128_i32 : i32
    %c1_i32_0 = arith.constant 1 : i32
    %5 = arith.cmpi slt, %3, %c1_i32_0 : i32
    %6 = arith.cmpi slt, %4, %0 : i32
    %7 = arith.andi %5, %6 : i1
    %c0_i32 = arith.constant 0 : i32
    %8 = arith.select %7, %3, %c0_i32 : i32
    %c128_i32_1 = arith.constant 128 : i32
    %9 = arith.addi %4, %c128_i32_1 : i32
    %10 = arith.minsi %9, %0 : i32
    %c128_i32_2 = arith.constant 128 : i32
    %11 = arith.muli %arg3, %c128_i32_2 : i32
    %12 = arith.cmpi slt, %11, %10 : i32
    %13 = arith.andi %7, %12 : i1
    %14 = arith.minsi %8, %1 : i32
    %15 = arith.select %13, %arg3, %14 : i32
    %c0_i32_3 = arith.constant 0 : i32
    %c0_i32_4 = arith.constant 0 : i32
    return %arg1, %c0_i32_3, %15 : i32, i32, i32
  }
  func.func @transform_2(%arg0: i32, %arg1: i32, %arg2: i32, %arg3: i32, %arg4: memref<2xi32, #tpu.memory_space<smem>>) -> (i32, i32, i32) {
    %c0 = arith.constant 0 : index
    %0 = memref.load %arg4[%c0] : memref<2xi32, #tpu.memory_space<smem>>
    %c1 = arith.constant 1 : index
    %1 = memref.load %arg4[%c1] : memref<2xi32, #tpu.memory_space<smem>>
    %c1_i32 = arith.constant 1 : i32
    %2 = arith.muli %arg0, %c1_i32 : i32
    %3 = arith.addi %2, %arg2 : i32
    %c128_i32 = arith.constant 128 : i32
    %4 = arith.muli %3, %c128_i32 : i32
    %c1_i32_0 = arith.constant 1 : i32
    %5 = arith.cmpi slt, %3, %c1_i32_0 : i32
    %6 = arith.cmpi slt, %4, %0 : i32
    %7 = arith.andi %5, %6 : i1
    %c0_i32 = arith.constant 0 : i32
    %8 = arith.select %7, %3, %c0_i32 : i32
    %c128_i32_1 = arith.constant 128 : i32
    %9 = arith.addi %4, %c128_i32_1 : i32
    %10 = arith.minsi %9, %0 : i32
    %c128_i32_2 = arith.constant 128 : i32
    %11 = arith.muli %arg3, %c128_i32_2 : i32
    %12 = arith.cmpi slt, %11, %10 : i32
    %13 = arith.andi %7, %12 : i1
    %14 = arith.minsi %8, %1 : i32
    %15 = arith.select %13, %arg3, %14 : i32
    %c0_i32_3 = arith.constant 0 : i32
    %c0_i32_4 = arith.constant 0 : i32
    return %arg1, %8, %c0_i32_3 : i32, i32, i32
  }
  func.func @transform_3(%arg0: i32, %arg1: i32, %arg2: i32, %arg3: i32, %arg4: memref<2xi32, #tpu.memory_space<smem>>) -> (i32, i32, i32) {
    %c0 = arith.constant 0 : index
    %0 = memref.load %arg4[%c0] : memref<2xi32, #tpu.memory_space<smem>>
    %c1 = arith.constant 1 : index
    %1 = memref.load %arg4[%c1] : memref<2xi32, #tpu.memory_space<smem>>
    %c1_i32 = arith.constant 1 : i32
    %2 = arith.muli %arg0, %c1_i32 : i32
    %3 = arith.addi %2, %arg2 : i32
    %c128_i32 = arith.constant 128 : i32
    %4 = arith.muli %3, %c128_i32 : i32
    %c1_i32_0 = arith.constant 1 : i32
    %5 = arith.cmpi slt, %3, %c1_i32_0 : i32
    %6 = arith.cmpi slt, %4, %0 : i32
    %7 = arith.andi %5, %6 : i1
    %c0_i32 = arith.constant 0 : i32
    %8 = arith.select %7, %3, %c0_i32 : i32
    %c128_i32_1 = arith.constant 128 : i32
    %9 = arith.addi %4, %c128_i32_1 : i32
    %10 = arith.minsi %9, %0 : i32
    %c128_i32_2 = arith.constant 128 : i32
    %11 = arith.muli %arg3, %c128_i32_2 : i32
    %12 = arith.cmpi slt, %11, %10 : i32
    %13 = arith.andi %7, %12 : i1
    %14 = arith.minsi %8, %1 : i32
    %15 = arith.select %13, %arg3, %14 : i32
    %c0_i32_3 = arith.constant 0 : i32
    return %arg1, %8, %15 : i32, i32, i32
  }
  func.func @transform_4(%arg0: i32, %arg1: i32, %arg2: i32, %arg3: i32, %arg4: memref<2xi32, #tpu.memory_space<smem>>) -> (i32, i32, i32) {
    %c1_i32 = arith.constant 1 : i32
    %0 = arith.muli %arg0, %c1_i32 : i32
    %1 = arith.addi %0, %arg1 : i32
    %c0_i32 = arith.constant 0 : i32
    %c0_i32_0 = arith.constant 0 : i32
    %c0_i32_1 = arith.constant 0 : i32
    return %1, %c0_i32, %c0_i32_0 : i32, i32, i32
  }
}

</mosaic_0001>

<bundles_post_ra>
// kernel: reax_bond_energy.1
= control target key start
LH: loop header
LB: loop body
LE: loop exit
PB: predicated region body
PF: predicated region fallthrough
CT: control target
= control target key end

     0   :  { %s4580_s0 = inlined_call_operand.vmem [shape: s32[2], index: 0, kind: input, shape index: {}]   ;;  %s4581_s1 = inlined_call_operand.vmem [shape: f32[9], index: 1, kind: input, shape index: {}]   ;;  %s4582_s2 = inlined_call_operand.vmem [shape: f32[2,2,128], index: 2, kind: input, shape index: {}]   ;;  %s4583_s3 = inlined_call_operand.vmem [shape: f32[2,128,2], index: 3, kind: input, shape index: {}]   ;;  %s4584_s4 = inlined_call_operand.vmem [shape: f32[2,128,128], index: 4, kind: input, shape index: {}]   ;;  %s4585_s5 = inlined_call_operand.vmem [shape: f32[2,1,1], index: 5, kind: output, shape index: {}]  }
   0x1   :  { %s10_s20 = sshll.u32 %s4580_s0, 4  ;;  %s11_s20 = int_to_ptr.vmem [resolvable:$true] %s10_s20 }
   0x2   :  { %s3155_s21 = scalar_lea.vmem %s11_s20, 16  ;;  %p3160_p1 = scmp.lt.s32.totalorder %s11_s20, %s11_s20 }
   0x3   :  { %p3156_p0 = scmp.ne.s32.totalorder %s11_s20, %s3155_s21  ;;  %p3161_p2 = scmp.lt.s32.totalorder %s3155_s21, %s3155_s21 }
   0x5   :  { %p3162_p3 = por %p3161_p2, %p3160_p1 }
   0x7   :  { %p3163_p4 = pnand %p3162_p3, %p3156_p0 }
   0x9   :  { %3166 = shalt.err (!%p3163_p4)  }
   0xa   :  { %s3183_s22 = smov [#allocation4]  }
   0xb   :  { %13 = dma.vmem_to_smem %s11_s20, 16, %s3183_s22, [#allocation3] }
   0xc   :  { %3179 = dma.done.wait [#allocation3], 16 }
   0xd   :  { %3180 = vsyncadd [#allocation3], 4294967280 }
   0xe   :  { %15 = sfence }
   0xf   :  { %16 = vsyncpa [#allocation6], 0  ;;  %s23_s25 = sshll.u32 %s4581_s1, 4  ;;  %s24_s25 = int_to_ptr.vmem [resolvable:$true] %s23_s25 }
  0x10   :  { %s3167_s0 = scalar_lea.vmem %s24_s25, 16  ;;  %p3172_p6 = scmp.lt.s32.totalorder %s24_s25, %s24_s25 }
  0x11   :  { %p3168_p5 = scmp.ne.s32.totalorder %s24_s25, %s3167_s0  ;;  %p3173_p7 = scmp.lt.s32.totalorder %s3167_s0, %s3167_s0 }
  0x13   :  { %p3174_p8 = por %p3173_p7, %p3172_p6 }
  0x15   :  { %p3175_p9 = pnand %p3174_p8, %p3168_p5 }
  0x17   :  { %3178 = shalt.err (!%p3175_p9)
}
  0x18   :  { %s3184_s26 = smov [#allocation5]  }
  0x19   :  { %26 = dma.vmem_to_smem %s24_s25, 16, %s3184_s26, [#allocation6]  }
  0x1a   :  { %3181 = dma.done.wait [#allocation6], 16  }
  0x1b   :  { %3182 = vsyncadd [#allocation6], 4294967280 }
  0x1c   :  { %147 = sfence }
  0x1d   :  { %s216_s27 = sld [smem:[#allocation4]]  ;;  %v3185_v0 = vmov 0.0  }
  0x1e   :  { %s2891_s28 = sld [smem:[#allocation4 + $0x1]]  ;;  %356 = vst [vmem:[#allocation2] sm:$0x1] %v3185_v0  ;;  %357 = vst [vmem:[#allocation2 + $0x1] sm:$0x1] %v3185_v0 }
  0x23   :  { %p2892_p10 = scmp.gt.s32.totalorder %s216_s27, 0 }
  0x24   :  { %p2896_p11 = scmp.gt.s32.totalorder %s2891_s28, 0 }
  0x25   :  { %p230_p12 = pnand %p2892_p10, %p2892_p10 }
  0x26   :  { %s4829_s28 = smov (%p2896_p11, %s2891_s28), 0 }
  0x27   :  { %s4831_s28 = smov (!%p230_p12, %s4829_s28), 0 }
  0x28   :  { %p235_p13 = scmp.lt.s32.totalorder %s4831_s28, 0  ;;  %361 = sbr.rel (%p230_p12) target bundleno = 384 (0x180), region = 29 }
  0x2a   :  { %s4833_s28 = smov (!%p235_p13, %s4831_s28), 0 }
  0x2b   :  { %s2898_s1 = sshll.u32 %s4833_s28, 1  ;;  %s2908_s29 = sshll.u32 %s4833_s28, 3 }
  0x2c   :  { %s3227_s7 = scalar_lea.vmem %s4582_s2, %s2898_s1  ;;  %s3232_s10 = scalar_lea.vmem %s4584_s4, %s2908_s29 }
  0x2d   :  { %v3237_v1 = vld [vmem:[%s4583_s3 + $0x10] sm:$0xff]  ;;  %v3242_v2 = vld [vmem:[%s4583_s3] sm:$0xff]  ;;  %v3186_v3 = vmov 0   ;;  %v3249_v4 = vld [vmem:[%s4583_s3 + $0x18] sm:$0xff]  ;;  %v3187_v34 = vmov 1   ;;  %s2914_s19 = sld [smem:[#allocation5 + $0x1]]  ;;  %v4586_v45 = vlaneseq }
  0x2e   :  { %2959 = vset.pattern.permute.xlu1 %v3186_v3  ;;  %2958 = vset.pattern.permute.xlu0 %v3186_v3  ;;  %v367_v5 = vld [vmem:[%s4583_s3 + $0x8] sm:$0xff]  ;;  %v370_v7 = vld [vmem:[%s4583_s3 + $0x20] sm:$0xff]  ;;  %v3267_v8 = vld [vmem:[%s4583_s3 + $0x38] sm:$0xff]  ;;  %s3400_s20 = sld [smem:[#allocation5 + $0x2]] }
  0x2f   :  { %452 = vperm.xlu1 %2959, %v3237_v1   ;;  %442 = vperm.xlu0 %2958, %v3242_v2   ;;  %v3258_v6 = vld [vmem:[%s4583_s3 + $0x28] sm:$0xff]  ;;  %v3272_v9 = vld [vmem:[%s4583_s3 + $0x30] sm:$0xff]  ;;  %v3284_v11 = vld [vmem:[%s4583_s3 + $0x40] sm:$0xff]  ;;  %s2917_s21 = sld [smem:[#allocation5 + $0x4]]  ;;  %v3442_v57 = vshrl.u32 %v4586_v45, 7 }
  0x30   :  { %v3279_v10 = vld [vmem:[%s4583_s3 + $0x48] sm:$0xff]  ;;  %v3291_v12 = vld [vmem:[%s4583_s3 + $0x58] sm:$0xff]  ;;  %v3296_v13 = vld [vmem:[%s4583_s3 + $0x50] sm:$0xff]  ;;  %s3404_s22 = sld [smem:[#allocation5 + $0x5]] }
  0x31   :  { %v3303_v14 = vld [vmem:[%s4583_s3 + $0x68] sm:$0xff]  ;;  %v3308_v15 = vld [vmem:[%s4583_s3 + $0x60] sm:$0xff]  ;;  %v3315_v16 = vld [vmem:[%s4583_s3 + $0x78] sm:$0xff]  ;;  %s2920_s23 = sld [smem:[#allocation5 + $0x7]] }
  0x32   :  { %v3320_v17 = vld [vmem:[%s4583_s3 + $0x70] sm:$0xff]  ;;  %v383_v18 = vld [vmem:[%s4583_s3 + $0x88] sm:$0xff]  ;;  %v382_v19 = vld [vmem:[%s4583_s3 + $0x80] sm:$0xff]  ;;  %s3410_s24 = sld [smem:[#allocation5 + $0x3]] }
  0x33   :  { %457 = vperm.xlu1 %2959, %v3249_v4   ;;  %447 = vperm.xlu0 %2958, %v367_v5   ;;  %v385_v20 = vld [vmem:[%s4583_s3 + $0x98] sm:$0xff]  ;;  %v384_v21 = vld [vmem:[%s4583_s3 + $0x90] sm:$0xff]  ;;  %v387_v22 = vld [vmem:[%s4583_s3 + $0xa8] sm:$0xff]  ;;  %s3415_s25 = sld [smem:[#allocation5 + $0x8]]  ;;  %v3423_v47 = vstv %s2914_s19 }
  0x34   :  { %v386_v23 = vld [vmem:[%s4583_s3 + $0xa0] sm:$0xff]  ;;  %v389_v24 = vld [vmem:[%s4583_s3 + $0xb8] sm:$0xff]  ;;  %v388_v25 = vld [vmem:[%s4583_s3 + $0xb0] sm:$0xff]  ;;  %s3418_s0 = sld [smem:[#allocation5 + $0x6]]  ;;  %v407_v49 = vstv %s3400_s20 }
  0x35   :  { %v391_v26 = vld [vmem:[%s4583_s3 + $0xc8] sm:$0xff]  ;;  %v390_v27 = vld [vmem:[%s4583_s3 + $0xc0] sm:$0xff]  ;;  %v3357_v28 = vld [vmem:[%s4583_s3 + $0xd8] sm:$0xff]  ;;  %v3432_v53 = vstv %s2917_s21 }
  0x36   :  { %v3362_v29 = vld [vmem:[%s4583_s3 + $0xd0] sm:$0xff]  ;;  %v3369_v30 = vld [vmem:[%s4583_s3 + $0xe8] sm:$0xff]  ;;  %v3374_v31 = vld [vmem:[%s4583_s3 + $0xe0] sm:$0xff]  ;;  %v421_v56 = vstv %s3404_s22 }
  0x37   :  { %467 = vperm.xlu1 %2959, %v3258_v6   ;;  %462 = vperm.xlu0 %2958, %v370_v7   ;;  %v3381_v32 = vld [vmem:[%s4583_s3 + $0xf8] sm:$0xff]  ;;  %v3386_v33 = vld [vmem:[%s4583_s3 + $0xf0] sm:$0xff]  ;;  %v841_v35 = vld [vmem:[%s3232_s10 + $0x8] sm:$0xff]  ;;  %s3397_s3 = sld [smem:[#allocation5]]  ;;  %v3446_v60 = vstv %s2920_s23 }
  0x38   :  { %v840_v36 = vld [vmem:[%s3232_s10] sm:$0xff]  ;;  %v873_v37 = vand.u32 2147483647, %v841_v35  ;;  %v842_v38 = vld [vmem:[%s3232_s10 + $0x10] sm:$0xff]  ;;  %v843_v40 = vld [vmem:[%s3232_s10 + $0x18] sm:$0xff]  ;;  %v418_v3 = vstv %s3410_s24 }
  0x39   :  { %v872_v39 = vand.u32 2147483647, %v840_v36  ;;  %v3408_v41 = vld [vmem:[%s3227_s7 + $0x1] ss:$0 sm:$0xff]  ;;  %v874_v42 = vand.u32 2147483647, %v842_v38 }
  0x3a   :  { %v3413_v43 = vmul.f32 %v3408_v41, %v873_v37  ;;  %v875_v44 = vand.u32 2147483647, %v843_v40  ;;  %v362_v50 = vld [vmem:[%s3227_s7] sm:$0x1]  ;;  %v845_v55 = vld [vmem:[%s3232_s10 + $0x28] sm:$0xff]  ;;  %v859_v37 = vld [vmem:[%s3232_s10 + $0x98] sm:$0xff] }
  0x3b   :  { %477 = vperm.xlu1 %2959, %v3267_v8   ;;  %472 = vperm.xlu0 %2958, %v3272_v9   ;;  %v3421_v46 = vmul.f32 %v3408_v41, %v872_v39  ;;  %v3426_v48 = vmul.f32 %v3408_v41, %v874_v42  ;;  %v844_v52 = vld [vmem:[%s3232_s10 + $0x20] sm:$0xff]  ;;  %v402_v58 = vmul.f32 %v3423_v47, %v362_v50 }
  0x3c   :  { %v945_v51 = vmax.f32 %v3413_v43, 1e-30  ;;  %v3435_v54 = vmul.f32 %v3408_v41, %v875_v44  ;;  %v408_v61 = vmul.f32 %v407_v49, %v362_v50  ;;  %v876_v63 = vand.u32 2147483647, %v844_v52 }
  0x3d   :  { %v944_v59 = vmax.f32 %v3421_v46, 1e-30  ;;  %v946_v62 = vmax.f32 %v3426_v48, 1e-30  ;;  %v404_v0 = vstv %s3397_s3 }
  0x3e   :  { %2962 = vlog2.f32 %v945_v51  ;;  %v847_v51 = vld [vmem:[%s3232_s10 + $0x38] sm:$0xff] }
  0x3f   :  { %487 = vperm.xlu1 %2959, %v3279_v10   ;;  %482 = vperm.xlu0 %2958, %v3284_v11   ;;  %2964 = vlog2.f32 %v944_v59  ;;  %v860_v59 = vld [vmem:[%s3232_s10 + $0xa0] sm:$0xff] }
  0x40   :  { %2966 = vlog2.f32 %v946_v62  ;;  %v891_v62 = vand.u32 2147483647, %v859_v37 }
  0x43   :  { %497 = vperm.xlu1 %2959, %v3291_v12   ;;  %492 = vperm.xlu0 %2958, %v3296_v13  }
  0x47   :  { %507 = vperm.xlu1 %2959, %v3303_v14   ;;  %502 = vperm.xlu0 %2958, %v3308_v15  }
  0x4b   :  { %517 = vperm.xlu1 %2959, %v3315_v16   ;;  %512 = vperm.xlu0 %2958, %v3320_v17  }
  0x4f   :  { %527 = vperm.xlu1 %2959, %v383_v18   ;;  %522 = vperm.xlu0 %2958, %v382_v19  }
  0x53   :  { %537 = vperm.xlu1 %2959, %v385_v20   ;;  %532 = vperm.xlu0 %2958, %v384_v21  }
  0x57   :  { %547 = vperm.xlu1 %2959, %v387_v22   ;;  %542 = vperm.xlu0 %2958, %v386_v23  }
  0x5b   :  { %557 = vperm.xlu1 %2959, %v389_v24   ;;  %552 = vperm.xlu0 %2958, %v388_v25  }
  0x5f   :  { %567 = vperm.xlu1 %2959, %v391_v26   ;;  %562 = vperm.xlu0 %2958, %v390_v27  }
  0x63   :  { %577 = vperm.xlu1 %2959, %v3357_v28   ;;  %572 = vperm.xlu0 %2958, %v3362_v29  }
  0x67   :  { %587 = vperm.xlu1 %2959, %v3369_v30   ;;  %582 = vperm.xlu0 %2958, %v3374_v31  }
  0x6b   :  { %597 = vperm.xlu1 %2959, %v3381_v32   ;;  %592 = vperm.xlu0 %2958, %v3386_v33  }
  0x6f   :  { %2961 = vset.pattern.permute.xlu1 %v3187_v34  ;;  %2960 = vset.pattern.permute.xlu0 %v3187_v34 }
  0x70   :  { %1333 = vperm.xlu1 %2961, %v367_v5   ;;  %1329 = vperm.xlu0 %2960, %v3242_v2   ;;  %v877_v2 = vand.u32 2147483647, %v845_v55  ;;  %v422_v5 = vmul.f32 %v421_v56, %v362_v50 }
  0x74   :  { %1337 = vperm.xlu1 %2961, %v3237_v1   ;;  %1341 = vperm.xlu0 %2960, %v3249_v4   ;;  %v416_v1 = vmul.f32 %v3432_v53, %v362_v50  ;;  %v435_v4 = vstv %s3415_s25 }
  0x78   :  { %1345 = vperm.xlu1 %2961, %v370_v7   ;;  %1393 = vperm.xlu0 %2960, %v382_v19   ;;  %v4587_v7 = vstv %s3418_s0  ;;  %v419_v19 = vadd.f32 %v418_v3, %v416_v1  ;;  %v2963_v1 = vpop.eup %2962 }
  0x7c   :  { %1397 = vperm.xlu1 %2961, %v383_v18   ;;  %1401 = vperm.xlu0 %2960, %v384_v21   ;;  %v857_v18 = vld [vmem:[%s3232_s10 + $0x88] sm:$0xff]  ;;  %v3472_v21 = vmul.f32 %v3408_v41, %v877_v2 }
  0x7e   :  { %4644 = vst [vmem:[#allocation10_spill] sm:$0xff] %v3472_v21  ;;  %v949_v38 = vmax.f32 %v3472_v21, 1e-30 }
  0x80   :  { %1405 = vperm.xlu1 %2961, %v385_v20   ;;  %1409 = vperm.xlu0 %2960, %v386_v23   ;;  %v436_v20 = vmul.f32 %v435_v4, %v362_v50  ;;  %v363_v23 = vld [vmem:[%s3227_s7 + $0x2] sm:$0x1] }
  0x81   :  { %v409_v42 = vmul.f32 %v407_v49, %v363_v23  ;;  %v423_v55 = vmul.f32 %v421_v56, %v363_v23  ;;  %v403_v49 = vmul.f32 %v3423_v47, %v363_v23  ;;  %v848_v56 = vld [vmem:[%s3232_s10 + $0x40] sm:$0xff] }
  0x83   :  { %v3523_v2 = vadd.f32 %v409_v42, %v3423_v47 }
  0x84   :  { %1349 = vperm.xlu1 %2961, %v3258_v6   ;;  %1413 = vperm.xlu0 %2960, %v387_v22   ;;  %v947_v6 = vmax.f32 %v3435_v54, 1e-30  ;;  %v424_v22 = vadd.f32 %v422_v5, %v3432_v53 }
  0x86   :  { %2968 = vlog2.f32 %v947_v6  ;;  %v892_v6 = vand.u32 2147483647, %v860_v59 }
  0x88   :  { %1353 = vperm.xlu1 %2961, %v3272_v9   ;;  %1417 = vperm.xlu0 %2960, %v388_v25   ;;  %v430_v9 = vmul.f32 %v3446_v60, %v362_v50  ;;  %v846_v25 = vld [vmem:[%s3232_s10 + $0x30] sm:$0xff] }
  0x89   :  { %v878_v39 = vand.u32 2147483647, %v846_v25 }
  0x8c   :  { %1357 = vperm.xlu1 %2961, %v3267_v8   ;;  %1421 = vperm.xlu0 %2960, %v389_v24   ;;  %v3458_v8 = vsub.s32 0, %v3442_v57 }
  0x8e   :  { %v3499_v40 = vrot.slane %v424_v22, %v3458_v8  ;;  %v880_v22 = vand.u32 2147483647, %v848_v56 }
  0x90   :  { %1361 = vperm.xlu1 %2961, %v3284_v11   ;;  %1425 = vperm.xlu0 %2960, %v390_v27   ;;  %v405_v11 = vadd.f32 %v404_v0, %v402_v58  ;;  %v3482_v27 = vld [vmem:[%s3227_s7 + $0x3] ss:$0 sm:$0xff]  ;;  %v3574_v59 = vmul.f32 %v3408_v41, %v880_v22 }
  0x91   :  { %v852_v22 = vld [vmem:[%s3232_s10 + $0x60] sm:$0xff] }
  0x92   :  { %v3489_v35 = vrot.slane %v405_v11, %v3458_v8  ;;  %v3536_v11 = vadd.f32 %v423_v55, %v3432_v53  ;;  %4652 = vst [vmem:[#allocation18_spill] sm:$0xff] %v3574_v59 }
  0x94   :  { %1365 = vperm.xlu1 %2961, %v3279_v10   ;;  %1429 = vperm.xlu0 %2960, %v391_v26   ;;  %v856_v10 = vld [vmem:[%s3232_s10 + $0x80] sm:$0xff]  ;;  %v433_v26 = vadd.f32 %v4587_v7, %v430_v9  ;;  %v849_v9 = vld [vmem:[%s3232_s10 + $0x48] sm:$0xff] }
  0x95   :  { %v888_v24 = vand.u32 2147483647, %v856_v10  ;;  %v3533_v10 = vmul.f32 %v3432_v53, %v363_v23 }
  0x96   :  { %v3508_v52 = vrot.slane %v433_v26, %v3458_v8  ;;  %v979_v26 = vmul.f32 0.6931472, %v2963_v1 }
  0x97   :  { %v3502_v44 = vmul.f32 %v3482_v27, %v888_v24  ;;  %v850_v24 = vld [vmem:[%s3232_s10 + $0x50] sm:$0xff] }
  0x98   :  { %1369 = vperm.xlu1 %2961, %v3296_v13   ;;  %1433 = vperm.xlu0 %2960, %v3362_v29   ;;  %v410_v13 = vadd.f32 %v408_v61, %v3423_v47  ;;  %v858_v29 = vld [vmem:[%s3232_s10 + $0x90] sm:$0xff]  ;;  %v437_v61 = vmul.f32 %v435_v4, %v363_v23  ;;  %v3539_v47 = vmul.f32 %v3446_v60, %v363_v23  ;;  %v882_v42 = vand.u32 2147483647, %v850_v24 }
  0x99   :  { %4645 = vst [vmem:[#allocation11_spill] sm:$0xff] %v3502_v44  ;;  %v890_v50 = vand.u32 2147483647, %v858_v29  ;;  %v960_v5 = vmax.f32 %v3502_v44, 1e-30 }
  0x9a   :  { %v3486_v34 = vrot.slane %v410_v13, %v3458_v8 }
  0x9b   :  { %v3527_v4 = vmul.f32 %v3482_v27, %v890_v50 }
  0x9c   :  { %1373 = vperm.xlu1 %2961, %v3291_v12   ;;  %1437 = vperm.xlu0 %2960, %v3357_v28   ;;  %v3466_v12 = vmul.f32 %v3408_v41, %v876_v63  ;;  %v889_v28 = vand.u32 2147483647, %v857_v18  ;;  %v861_v18 = vld [vmem:[%s3232_s10 + $0xa8] sm:$0xff] }
  0x9d   :  { %4648 = vst [vmem:[#allocation14_spill] sm:$0xff] %v3527_v4 }
  0x9e   :  { %4643 = vst [vmem:[#allocation9_spill] sm:$0xff] %v3466_v12  ;;  %v948_v36 = vmax.f32 %v3466_v12, 1e-30  ;;  %v3511_v58 = vmul.f32 %v3482_v27, %v889_v28 }
  0xa0   :  { %1377 = vperm.xlu1 %2961, %v3308_v15   ;;  %1441 = vperm.xlu0 %2960, %v3374_v31   ;;  %v438_v15 = vadd.f32 %v436_v20, %v3446_v60  ;;  %v3494_v31 = vrot.slane %v419_v19, %v3458_v8  ;;  %4646 = vst [vmem:[#allocation12_spill] sm:$0xff] %v3511_v58  ;;  %2970 = vlog2.f32 %v948_v36  ;;  %v961_v13 = vmax.f32 %v3511_v58, 1e-30  ;;  %v2965_v19 = vpop.eup %2964 }
  0xa1   :  { %2972 = vlog2.f32 %v949_v38  ;;  %v3545_v20 = vadd.f32 %v404_v0, %v403_v49  ;;  %v2967_v53 = vpop.eup %2966  ;;  %v881_v0 = vand.u32 2147483647, %v849_v9  ;;  %v3564_v36 = vmul.f32 %v3482_v27, %v892_v6  ;;  %v851_v49 = vld [vmem:[%s3232_s10 + $0x58] sm:$0xff]  ;;  %v862_v6 = vld [vmem:[%s3232_s10 + $0xb0] sm:$0xff] }
  0xa2   :  { %v3516_v63 = vrot.slane %v438_v15, %v3458_v8  ;;  %2974 = vlog2.f32 %v960_v5  ;;  %v893_v15 = vand.u32 2147483647, %v861_v18  ;;  %v2969_v37 = vpop.eup %2968  ;;  %v3596_v18 = vmul.f32 %v3408_v41, %v882_v42 }
  0xa3   :  { %4651 = vst [vmem:[#allocation17_spill] sm:$0xff] %v3564_v36  ;;  %2976 = vlog2.f32 %v961_v13  ;;  %v983_v56 = vmul.f32 0.6931472, %v2969_v37  ;;  %v964_v1 = vmax.f32 %v3564_v36, 1e-30 }
  0xa4   :  { %1381 = vperm.xlu1 %2961, %v3303_v14   ;;  %1445 = vperm.xlu0 %2960, %v3369_v30   ;;  %v3519_v14 = vmul.f32 %v3408_v41, %v878_v39  ;;  %v879_v30 = vand.u32 2147483647, %v847_v51  ;;  %v977_v39 = vmul.f32 0.6931472, %v2965_v19  ;;  %v981_v51 = vmul.f32 0.6931472, %v2967_v53 }
  0xa5   :  { %v3588_v5 = vmul.f32 %v3482_v27, %v893_v15  ;;  %4655 = vst [vmem:[#allocation21_spill] sm:$0xff] %v3596_v18  ;;  %v883_v19 = vand.u32 2147483647, %v851_v49  ;;  %v954_v7 = vmax.f32 %v3596_v18, 1e-30 }
  0xa6   :  { %4647 = vst [vmem:[#allocation13_spill] sm:$0xff] %v3519_v14  ;;  %v950_v28 = vmax.f32 %v3519_v14, 1e-30  ;;  %v3560_v29 = vmul.f32 %v3408_v41, %v879_v30  ;;  %v3584_v30 = vmul.f32 %v3408_v41, %v881_v0  ;;  %v869_v14 = vld [vmem:[%s3232_s10 + $0xe8] sm:$0xff] }
  0xa7   :  { %4654 = vst [vmem:[#allocation20_spill] sm:$0xff] %v3588_v5  ;;  %v3623_v36 = vmul.f32 %v3408_v41, %v883_v19  ;;  %v3636_v19 = vrot.slane %v3523_v2, %v3458_v8 }
  0xa8   :  { %1385 = vperm.xlu1 %2961, %v3320_v17   ;;  %1449 = vperm.xlu0 %2960, %v3386_v33   ;;  %v3548_v17 = vadd.f32 %v437_v61, %v3446_v60  ;;  %v3551_v33 = vmul.f32 %v3482_v27, %v891_v62  ;;  %4650 = vst [vmem:[#allocation16_spill] sm:$0xff] %v3560_v29  ;;  %v962_v60 = vmax.f32 %v3527_v4, 1e-30  ;;  %2978 = vlog2.f32 %v950_v28 }
  0xa9   :  { %v951_v62 = vmax.f32 %v3560_v29, 1e-30  ;;  %4653 = vst [vmem:[#allocation19_spill] sm:$0xff] %v3584_v30  ;;  %v952_v28 = vmax.f32 %v3574_v59, 1e-30  ;;  %4656 = vst [vmem:[#allocation22_spill] sm:$0xff] %v3623_v36 }
  0xaa   :  { %4649 = vst [vmem:[#allocation15_spill] sm:$0xff] %v3551_v33  ;;  %v3554_v25 = vpop.permute.xlu1 %452  ;;  %v3556_v23 = vpop.permute.xlu0 %442  ;;  %v963_v55 = vmax.f32 %v3551_v33, 1e-30  ;;  %2980 = vlog2.f32 %v962_v60  ;;  %v953_v42 = vmax.f32 %v3584_v30, 1e-30  ;;  %4658 = vst [vmem:[#allocation24_spill] sm:$0xff] %v3636_v19 }
  0xab   :  { %v768_v38 = vmul.f32 %v3516_v63, %v3556_v23  ;;  %v770_v50 = vmul.f32 %v3516_v63, %v3554_v25 }
  0xac   :  { %1389 = vperm.xlu1 %2961, %v3315_v16   ;;  %1453 = vperm.xlu0 %2960, %v3381_v32   ;;  %2982 = vlog2.f32 %v963_v55  ;;  %v965_v55 = vmax.f32 %v3588_v5, 1e-30 }
  0xad   :  { %v808_v61 = vadd.f32 %v3508_v52, %v768_v38  ;;  %v810_v24 = vadd.f32 %v3508_v52, %v770_v50  ;;  %v3601_v0 = vpop.eup %2970  ;;  %v894_v38 = vand.u32 2147483647, %v862_v6  ;;  %2984 = vlog2.f32 %v951_v62  ;;  %v853_v50 = vld [vmem:[%s3232_s10 + $0x68] sm:$0xff]  ;;  %v864_v62 = vld [vmem:[%s3232_s10 + $0xc0] sm:$0xff] }
  0xae   :  { %v3578_v16 = vpop.permute.xlu1 %457  ;;  %v3580_v32 = vpop.permute.xlu0 %447  ;;  %2986 = vlog2.f32 %v964_v1 }
  0xaf   :  { %v771_v9 = vmul.f32 %v3516_v63, %v3578_v16  ;;  %v769_v13 = vmul.f32 %v3516_v63, %v3580_v32  ;;  %v1040_v53 = vmul.f32 %v977_v39, %v808_v61  ;;  %v3610_v49 = vpop.eup %2972  ;;  %v3615_v39 = vadd.f32 %v418_v3, %v3533_v10  ;;  %v863_v61 = vld [vmem:[%s3232_s10 + $0xb8] sm:$0xff]  ;;  %v865_v3 = vld [vmem:[%s3232_s10 + $0xc8] sm:$0xff] }
  0xb0   :  { %v1042_v4 = vmul.f32 %v981_v51, %v810_v24  ;;  %2988 = vlog2.f32 %v952_v28  ;;  %v885_v10 = vand.u32 2147483647, %v853_v50  ;;  %v896_v51 = vand.u32 2147483647, %v864_v62  ;;  %v3642_v28 = vpop.eup %2974 }
  0xb1   :  { %v809_v60 = vadd.f32 %v3508_v52, %v769_v13  ;;  %v884_v13 = vand.u32 2147483647, %v852_v22  ;;  %v811_v45 = vadd.f32 %v3508_v52, %v771_v9  ;;  %v1072_v33 = vmul.f32 1.442695, %v1040_v53  ;;  %v854_v53 = vld [vmem:[%s3232_s10 + $0x70] sm:$0xff] }
  0xb2   :  { %v3604_v15 = vpop.permute.xlu1 %467  ;;  %v3606_v37 = vpop.permute.xlu0 %462  ;;  %v895_v22 = vand.u32 2147483647, %v863_v61  ;;  %2990 = vlog2.f32 %v953_v42  ;;  %v955_v42 = vmax.f32 %v3623_v36, 1e-30  ;;  %v855_v61 = vld [vmem:[%s3232_s10 + $0x78] sm:$0xff]  ;;  %v3650_v62 = vmul.f32 %v3408_v41, %v885_v10 }
  0xb3   :  { %v1041_v6 = vmul.f32 %v979_v26, %v809_v60  ;;  %v3631_v26 = vmul.f32 %v3482_v27, %v894_v38  ;;  %v866_v60 = vld [vmem:[%s3232_s10 + $0xd0] sm:$0xff]  ;;  %2992 = vlog2.f32 %v965_v55  ;;  %v3639_v24 = vmul.f32 %v3408_v41, %v884_v13  ;;  %v867_v55 = vld [vmem:[%s3232_s10 + $0xd8] sm:$0xff] }
  0xb4   :  { %v1043_v50 = vmul.f32 %v983_v56, %v811_v45  ;;  %v897_v38 = vand.u32 2147483647, %v865_v3  ;;  %2994 = vlog2.f32 %v954_v7  ;;  %v1076_v2 = vmul.f32 1.442695, %v1042_v4  ;;  %4660 = vst [vmem:[#allocation26_spill] sm:$0xff] %v3650_v62  ;;  %v868_v56 = vld [vmem:[%s3232_s10 + $0xe0] sm:$0xff] }
  0xb5   :  { %v1074_v9 = vmul.f32 1.442695, %v1041_v6  ;;  %4657 = vst [vmem:[#allocation23_spill] sm:$0xff] %v3631_v26  ;;  %4659 = vst [vmem:[#allocation25_spill] sm:$0xff] %v3639_v24  ;;  %v3646_v6 = vpop.eup %2976  ;;  %2996 = vpow2.f32 %v1072_v33  ;;  %v898_v58 = vand.u32 2147483647, %v866_v60  ;;  %v3658_v7 = vmul.f32 %v3482_v27, %v895_v22 }
  0xb6   :  { %v3626_v1 = vpop.permute.xlu1 %477  ;;  %v3628_v5 = vpop.permute.xlu0 %472  ;;  %v966_v45 = vmax.f32 %v3631_v26, 1e-30  ;;  %v886_v3 = vand.u32 2147483647, %v854_v53  ;;  %v772_v4 = vmul.f32 %v3516_v63, %v3606_v37  ;;  %v3664_v33 = vmul.f32 %v3482_v27, %v896_v51 }
  0xb7   :  { %2998 = vpow2.f32 %v1074_v9  ;;  %4661 = vst [vmem:[#allocation27_spill] sm:$0xff] %v3658_v7  ;;  %v2979_v36 = vpop.eup %2978  ;;  %v956_v10 = vmax.f32 %v3639_v24, 1e-30  ;;  %v887_v60 = vand.u32 2147483647, %v855_v61  ;;  %v3668_v9 = vmul.f32 %v3482_v27, %v897_v38 }
  0xb8   :  { %4662 = vst [vmem:[#allocation28_spill] sm:$0xff] %v3664_v33  ;;  %v2981_v18 = vpop.eup %2980  ;;  %v1078_v30 = vmul.f32 1.442695, %v1043_v50  ;;  %3000 = vlog2.f32 %v955_v42  ;;  %v899_v22 = vand.u32 2147483647, %v867_v55  ;;  %v3671_v53 = vmul.f32 %v3482_v27, %v898_v58 }
  0xb9   :  { %4663 = vst [vmem:[#allocation29_spill] sm:$0xff] %v3668_v9  ;;  %3002 = vpow2.f32 %v1076_v2  ;;  %v900_v26 = vand.u32 2147483647, %v868_v56  ;;  %v957_v59 = vmax.f32 %v3650_v62, 1e-30  ;;  %v2983_v29 = vpop.eup %2982  ;;  %v3681_v42 = vmul.f32 %v3408_v41, %v886_v3 }
  0xba   :  { %v3652_v13 = vpop.permute.xlu1 %487  ;;  %v3654_v44 = vpop.permute.xlu0 %482  ;;  %4664 = vst [vmem:[#allocation30_spill] sm:$0xff] %v3671_v53  ;;  %v985_v50 = vmul.f32 0.6931472, %v3601_v0  ;;  %3004 = vlog2.f32 %v966_v45  ;;  %v967_v38 = vmax.f32 %v3658_v7, 1e-30  ;;  %v812_v58 = vadd.f32 %v3508_v52, %v772_v4 }
  0xbb   :  { %4665 = vst [vmem:[#allocation31_spill] sm:$0xff] %v3681_v42  ;;  %v2985_v61 = vpop.eup %2984  ;;  %v968_v2 = vmax.f32 %v3664_v33, 1e-30  ;;  %3006 = vlog2.f32 %v956_v10  ;;  %v3686_v55 = vmul.f32 %v3408_v41, %v887_v60  ;;  %v3690_v62 = vrot.slane %v3536_v11, %v3458_v8 }
  0xbc   :  { %v2987_v56 = vpop.eup %2986  ;;  %3008 = vpow2.f32 %v1078_v30  ;;  %v969_v0 = vmax.f32 %v3668_v9, 1e-30  ;;  %v3694_v45 = vmul.f32 %v3482_v27, %v899_v22  ;;  %v4669_v3 = vstv %s3418_s0 }
  0xbd   :  { %4666 = vst [vmem:[#allocation32_spill] sm:$0xff] %v3686_v55  ;;  %4667 = vst [vmem:[#allocation33_spill] sm:$0xff] %v3690_v62  ;;  %v3699_v4 = vadd.f32 %v4669_v3, %v3539_v47  ;;  %v970_v10 = vmax.f32 %v3671_v53, 1e-30  ;;  %v3703_v41 = vmul.f32 %v3482_v27, %v900_v26  ;;  %3010 = vlog2.f32 %v957_v59  ;;  %v2989_v60 = vpop.eup %2988 }
  0xbe   :  { %v3674_v51 = vpop.permute.xlu1 %497  ;;  %v3676_v24 = vpop.permute.xlu0 %492  ;;  %4668 = vst [vmem:[#allocation34_spill] sm:$0xff] %v3694_v45  ;;  %v3711_v30 = vrot.slane %v3545_v20, %v3458_v8  ;;  %v3715_v22 = vrot.slane %v3548_v17, %v3458_v8  ;;  %3012 = vlog2.f32 %v967_v38  ;;  %v958_v47 = vmax.f32 %v3681_v42, 1e-30 }
  0xbf   :  { %4670 = vst [vmem:[#allocation35_spill] sm:$0xff] %v3703_v41  ;;  %v2991_v3 = vpop.eup %2990  ;;  %v3720_v59 = vrot.slane %v3615_v39, %v3458_v8  ;;  %v1044_v26 = vmul.f32 %v985_v50, %v812_v58  ;;  %3014 = vlog2.f32 %v968_v2  ;;  %v959_v53 = vmax.f32 %v3686_v55, 1e-30 }
  0xc0   :  { %4671 = vst [vmem:[#allocation36_spill] sm:$0xff] %v3711_v30  ;;  %4672 = vst [vmem:[#allocation37_spill] sm:$0xff] %v3715_v22  ;;  %v2993_v9 = vpop.eup %2992  ;;  %v3724_v20 = vmul.f32 0.6931472, %v3642_v28  ;;  %v3727_v7 = vmul.f32 0.6931472, %v3610_v49  ;;  %3016 = vlog2.f32 %v969_v0  ;;  %v689_v21 = vmul.f32 %v3499_v40, %v3580_v32 }
  0xc1   :  { %4673 = vst [vmem:[#allocation38_spill] sm:$0xff] %v3720_v59  ;;  %v971_v17 = vmax.f32 %v3694_v45, 1e-30  ;;  %v2995_v38 = vpop.eup %2994  ;;  %v3731_v42 = vmul.f32 0.6931472, %v3646_v6  ;;  %3018 = vlog2.f32 %v970_v10  ;;  %v4679_v6 = vlaneseq }
  0xc2   :  { %v3705_v33 = vpop.permute.xlu1 %507  ;;  %v3707_v11 = vpop.permute.xlu0 %502  ;;  %4674 = vst [vmem:[#allocation39_spill] sm:$0xff] %v3724_v20  ;;  %v3733_v39 = vmul.f32 0.6931472, %v2979_v36  ;;  %v972_v50 = vmax.f32 %v3703_v41, 1e-30  ;;  %3020 = vlog2.f32 %v958_v47  ;;  %v688_v36 = vmul.f32 %v3499_v40, %v3556_v23 }
  0xc3   :  { %4675 = vst [vmem:[#allocation40_spill] sm:$0xff] %v3731_v42  ;;  %v2997_v58 = vpop.eup %2996  ;;  %v3740_v49 = vmul.f32 0.6931472, %v2981_v18  ;;  %v3742_v0 = vmul.f32 0.6931472, %v2983_v29  ;;  %v3749_v10 = vand.u32 127, %v4679_v6  ;;  %3022 = vlog2.f32 %v959_v53 }
  0xc4   :  { %v3744_v45 = vmul.f32 0.6931472, %v2985_v61  ;;  %v2999_v55 = vpop.eup %2998  ;;  %v1080_v41 = vmul.f32 1.442695, %v1044_v26  ;;  %v3755_v18 = vadd.s32 8, %v3442_v57  ;;  %3024 = vlog2.f32 %v971_v17 }
  0xc5   :  { %4676 = vst [vmem:[#allocation41_spill] sm:$0xff] %v3740_v49  ;;  %4677 = vst [vmem:[#allocation42_spill] sm:$0xff] %v3742_v0  ;;  %v3757_v29 = vmul.f32 0.6931472, %v2987_v56  ;;  %v3001_v61 = vpop.eup %3000  ;;  %v1136_v47 = vsub.f32 1.0, %v2997_v58  ;;  %v3760_v0 = vadd.s32 16, %v3442_v57  ;;  %3026 = vlog2.f32 %v972_v50 }
  0xc6   :  { %v3736_v2 = vpop.permute.xlu1 %517  ;;  %v3738_v28 = vpop.permute.xlu0 %512  ;;  %4678 = vst [vmem:[#allocation43_spill] sm:$0xff] %v3744_v45  ;;  %4680 = vst [vmem:[#allocation44_spill] sm:$0xff] %v3755_v18  ;;  %v3762_v49 = vmul.f32 0.6931472, %v2989_v60  ;;  %v690_v53 = vmul.f32 %v3499_v40, %v3554_v25  ;;  %v1137_v12 = vsub.f32 1.0, %v2999_v55  ;;  %v3771_v56 = vadd.s32 24, %v3442_v57 }
  0xc7   :  { %4681 = vst [vmem:[#allocation45_spill] sm:$0xff] %v3757_v29  ;;  %4682 = vst [vmem:[#allocation46_spill] sm:$0xff] %v3760_v0  ;;  %v3003_v26 = vpop.eup %3002  ;;  %v901_v17 = vand.u32 2147483647, %v869_v14  ;;  %v608_v29 = vmul.f32 %v3486_v34, %v3556_v23  ;;  %v728_v60 = vadd.f32 %v3494_v31, %v688_v36  ;;  %v773_v50 = vmul.f32 %v3516_v63, %v3604_v15 }
  0xc8   :  { %4683 = vst [vmem:[#allocation47_spill] sm:$0xff] %v3762_v49  ;;  %4686 = vst [vmem:[#allocation50_spill] sm:$0xff] %v3771_v56  ;;  %v3005_v58 = vpop.eup %3004  ;;  %3028 = vpow2.f32 %v1080_v41  ;;  %v691_v59 = vmul.f32 %v3499_v40, %v3578_v16  ;;  %v609_v55 = vmul.f32 %v3486_v34, %v3580_v32  ;;  %v729_v30 = vadd.f32 %v3494_v31, %v689_v21 }
  0xc9   :  { %v3007_v20 = vpop.eup %3006  ;;  %v3783_v14 = vmul.f32 0.6931472, %v2991_v3  ;;  %v1168_v49 = vmul.f32 %v1136_v47, %v728_v60  ;;  %v1138_v23 = vsub.f32 1.0, %v3003_v26  ;;  %v3786_v36 = vadd.s32 32, %v3442_v57 }
  0xca   :  { %v3766_v6 = vpop.permute.xlu1 %527  ;;  %v3768_v42 = vpop.permute.xlu0 %522  ;;  %v3788_v19 = vmul.f32 0.6931472, %v2993_v9  ;;  %v3794_v45 = vmul.f32 0.6931472, %v2995_v38  ;;  %v3796_v32 = vmul.f32 0.6931472, %v3001_v61  ;;  %v3799_v21 = vmul.f32 %v3482_v27, %v901_v17 }
  0xcb   :  { %4684 = vst [vmem:[#allocation48_spill] sm:$0xff] %v3766_v6  ;;  %4685 = vst [vmem:[#allocation49_spill] sm:$0xff] %v3768_v42  ;;  %v3009_v62 = vpop.eup %3008  ;;  %v1169_v42 = vmul.f32 %v1137_v12, %v729_v30  ;;  %v610_v47 = vmul.f32 %v3486_v34, %v3554_v25  ;;  %v730_v9 = vadd.f32 %v3494_v31, %v690_v53  ;;  %v3812_v25 = vmul.f32 0.6931472, %v3007_v20 }
  0xcc   :  { %4687 = vst [vmem:[#allocation51_spill] sm:$0xff] %v3783_v14  ;;  %4688 = vst [vmem:[#allocation52_spill] sm:$0xff] %v3786_v36  ;;  %v3011_v41 = vpop.eup %3010  ;;  %v648_v26 = vadd.f32 %v3489_v35, %v608_v29  ;;  %v813_v60 = vadd.f32 %v3508_v52, %v773_v50  ;;  %v611_v12 = vmul.f32 %v3486_v34, %v3578_v16  ;;  %v1139_v27 = vsub.f32 1.0, %v3009_v62 }
  0xcd   :  { %4689 = vst [vmem:[#allocation53_spill] sm:$0xff] %v3788_v19  ;;  %4691 = vst [vmem:[#allocation55_spill] sm:$0xff] %v3794_v45  ;;  %v3013_v3 = vpop.eup %3012  ;;  %v731_v30 = vadd.f32 %v3494_v31, %v691_v59  ;;  %v649_v38 = vadd.f32 %v3489_v35, %v609_v55  ;;  %v3810_v45 = vmul.f32 0.6931472, %v3005_v58  ;;  %v3820_v59 = vmul.f32 0.6931472, %v3011_v41 }
  0xce   :  { %v3790_v6 = vpop.permute.xlu1 %537  ;;  %v3792_v22 = vpop.permute.xlu0 %532  ;;  %4692 = vst [vmem:[#allocation56_spill] sm:$0xff] %v3796_v32  ;;  %4693 = vst [vmem:[#allocation57_spill] sm:$0xff] %v3799_v21  ;;  %v1200_v17 = vadd.f32 %v1168_v49, %v648_v26  ;;  %v1170_v32 = vmul.f32 %v1138_v23, %v730_v9  ;;  %v3818_v16 = vmul.f32 0.6931472, %v3013_v3  ;;  %v650_v62 = vadd.f32 %v3489_v35, %v610_v47 }
  0xcf   :  { %4690 = vst [vmem:[#allocation54_spill] sm:$0xff] %v3792_v22  ;;  %v3015_v19 = vpop.eup %3014  ;;  %4694 = vst [vmem:[#allocation58_spill] sm:$0xff] %v3810_v45  ;;  %v1201_v22 = vadd.f32 %v1169_v42, %v649_v38  ;;  %v1171_v14 = vmul.f32 %v1139_v27, %v731_v30  ;;  %v3824_v49 = vadd.s32 40, %v3442_v57  ;;  %v1045_v20 = vmul.f32 %v3727_v7, %v813_v60 }
  0xd0   :  { %v3017_v61 = vpop.eup %3016  ;;  %4695 = vst [vmem:[#allocation59_spill] sm:$0xff] %v3818_v16  ;;  %4696 = vst [vmem:[#allocation60_spill] sm:$0xff] %v3820_v59  ;;  %v3827_v58 = vmul.f32 0.6931472, %v3015_v19  ;;  %v651_v9 = vadd.f32 %v3489_v35, %v611_v12  ;;  %v3831_v42 = vadd.s32 48, %v3442_v57  ;;  %v1202_v30 = vadd.f32 %v1170_v32, %v650_v62  ;;  %v3858_v62 = vld [vmem:[%s3232_s10 + $0xf0] sm:$0xff] }
  0xd1   :  { %v3019_v53 = vpop.eup %3018  ;;  %4697 = vst [vmem:[#allocation61_spill] sm:$0xff] %v3824_v49  ;;  %v3833_v3 = vmul.f32 0.6931472, %v3017_v61  ;;  %v973_v41 = vmax.f32 %v3799_v21, 1e-30  ;;  %v3837_v38 = vadd.s32 56, %v3442_v57  ;;  %v3852_v32 = vrot.slane %v3699_v4, %v3458_v8 }
  0xd2   :  { %v3814_v29 = vpop.permute.xlu1 %547  ;;  %v3816_v50 = vpop.permute.xlu0 %542  ;;  %4698 = vst [vmem:[#allocation62_spill] sm:$0xff] %v3827_v58  ;;  %4699 = vst [vmem:[#allocation63_spill] sm:$0xff] %v3831_v42  ;;  %v1232_v47 = vmul.f32 1.442695, %v1200_v17  ;;  %v3839_v7 = vmul.f32 0.6931472, %v3019_v53  ;;  %v1203_v58 = vadd.f32 %v1171_v14, %v651_v9  ;;  %vm1527_vm0 = vcmp.lt.s32.totalorder %v3749_v10, %v3755_v18 }
  0xd3   :  { %v3021_v55 = vpop.eup %3020  ;;  %4700 = vst [vmem:[#allocation64_spill] sm:$0xff] %v3833_v3  ;;  %4701 = vst [vmem:[#allocation65_spill] sm:$0xff] %v3837_v38  ;;  %v1234_v27 = vmul.f32 1.442695, %v1201_v22  ;;  %v3846_v61 = vadd.s32 64, %v3442_v57  ;;  %v3855_v53 = vadd.s32 72, %v3442_v57  ;;  %v692_v22 = vmul.f32 %v3499_v40, %v3606_v37 }
  0xd4   :  { %v3023_v23 = vpop.eup %3022  ;;  %4702 = vst [vmem:[#allocation66_spill] sm:$0xff] %v3839_v7  ;;  %v3848_v21 = vmul.f32 0.6931472, %v3021_v55  ;;  %v1082_v17 = vmul.f32 1.442695, %v1045_v20  ;;  %4706 = vst [vmem:[#allocation70_spill] sm:$0xff] %v3858_v62  ;;  %3030 = vlog2.f32 %v973_v41  ;;  %v693_v41 = vmul.f32 %v3499_v40, %v3604_v15 }
  0xd5   :  { %v3025_v26 = vpop.eup %3024  ;;  %4703 = vst [vmem:[#allocation67_spill] sm:$0xff] %v3846_v61  ;;  %4705 = vst [vmem:[#allocation69_spill] sm:$0xff] %v3855_v53  ;;  %v3860_v7 = vmul.f32 0.6931472, %v3023_v23  ;;  %v3865_v14 = vadd.s32 80, %v3442_v57  ;;  %3032 = vpow2.f32 %v1232_v47  ;;  %v3870_v4 = vadd.s32 88, %v3442_v57 }
  0xd6   :  { %v3027_v19 = vpop.eup %3026  ;;  %v3841_v60 = vpop.permute.xlu1 %557  ;;  %4704 = vst [vmem:[#allocation68_spill] sm:$0xff] %v3848_v21  ;;  %v3867_v55 = vmul.f32 0.6931472, %v3025_v26  ;;  %v1236_v8 = vmul.f32 1.442695, %v1202_v30  ;;  %v613_v23 = vmul.f32 %v3486_v34, %v3604_v15  ;;  %3034 = vpow2.f32 %v1234_v27 }
  0xd7   :  { %v3843_v12 = vpop.permute.xlu0 %552  ;;  %4707 = vst [vmem:[#allocation71_spill] sm:$0xff] %v3860_v7  ;;  %v3029_v3 = vpop.eup %3028  ;;  %4708 = vst [vmem:[#allocation72_spill] sm:$0xff] %v3865_v14  ;;  %v3872_v20 = vmul.f32 0.6931472, %v3027_v19  ;;  %v1238_v21 = vmul.f32 1.442695, %v1203_v58  ;;  %v612_v47 = vmul.f32 %v3486_v34, %v3606_v37  ;;  %3036 = vpow2.f32 %v1082_v17 }
  0xd8   :  { %4709 = vst [vmem:[#allocation73_spill] sm:$0xff] %v3867_v55  ;;  %4710 = vst [vmem:[#allocation74_spill] sm:$0xff] %v3870_v4  ;;  %v1140_v30 = vsub.f32 1.0, %v3029_v3  ;;  %v732_v19 = vadd.f32 %v3494_v31, %v692_v22  ;;  %v695_v4 = vmul.f32 %v3499_v40, %v3626_v1  ;;  %v775_v58 = vmul.f32 %v3516_v63, %v3626_v1 }
  0xd9   :  { %4711 = vst [vmem:[#allocation75_spill] sm:$0xff] %v3872_v20  ;;  %v615_v20 = vmul.f32 %v3486_v34, %v3626_v1  ;;  %v614_v27 = vmul.f32 %v3486_v34, %v3628_v5  ;;  %v694_v15 = vmul.f32 %v3499_v40, %v3628_v5  ;;  %v774_v37 = vmul.f32 %v3516_v63, %v3628_v5 }
  0xda   :  { %v3876_v9 = vpop.permute.xlu1 %567  ;;  %3038 = vpow2.f32 %v1236_v8  ;;  %v617_v3 = vmul.f32 %v3486_v34, %v3652_v13  ;;  %v697_v17 = vmul.f32 %v3499_v40, %v3652_v13  ;;  %v777_v22 = vmul.f32 %v3516_v63, %v3652_v13 }
  0xdb   :  { %v3878_v7 = vpop.permute.xlu0 %562  ;;  %3040 = vpow2.f32 %v1238_v21  ;;  %v3909_v62 = vadd.f32 %v3489_v35, %v613_v23  ;;  %v3912_v5 = vadd.f32 %v3494_v31, %v693_v41  ;;  %v616_v8 = vmul.f32 %v3486_v34, %v3654_v44 }
  0xdc   :  { %4712 = vst [vmem:[#allocation76_spill] sm:$0xff] %v3878_v7  ;;  %v1172_v55 = vmul.f32 %v1140_v30, %v732_v19  ;;  %v652_v14 = vadd.f32 %v3489_v35, %v612_v47  ;;  %v3918_v59 = vadd.f32 %v3489_v35, %v615_v20  ;;  %v3921_v13 = vadd.f32 %v3494_v31, %v695_v4 }
  0xdd   :  { %v3924_v21 = vadd.f32 %v3508_v52, %v775_v58  ;;  %v3927_v23 = vadd.f32 %v3489_v35, %v614_v27  ;;  %v3930_v41 = vadd.f32 %v3494_v31, %v694_v15  ;;  %v814_v53 = vadd.f32 %v3508_v52, %v774_v37 }
  0xde   :  { %v3904_v1 = vpop.permute.xlu1 %577  ;;  %v696_v47 = vmul.f32 %v3499_v40, %v3654_v44  ;;  %v3936_v20 = vadd.f32 %v3489_v35, %v617_v3  ;;  %v3939_v4 = vadd.f32 %v3494_v31, %v697_v17  ;;  %v3942_v30 = vadd.f32 %v3508_v52, %v777_v22 }
  0xdf   :  { %4713 = vst [vmem:[#allocation77_spill] sm:$0xff] %v3904_v1  ;;  %v3906_v26 = vpop.permute.xlu0 %572  ;;  %v776_v19 = vmul.f32 %v3516_v63, %v3654_v44  ;;  %v3951_v15 = vadd.f32 %v3489_v35, %v616_v8  ;;  %v619_v37 = vmul.f32 %v3486_v34, %v3674_v51  ;;  %v699_v3 = vmul.f32 %v3499_v40, %v3674_v51 }
  0xe0   :  { %4714 = vst [vmem:[#allocation78_spill] sm:$0xff] %v3906_v26  ;;  %4715 = vst [vmem:[#allocation79_spill] sm:$0xff] %v3936_v20  ;;  %vm1526_vm1 = vcmp.lt.s32.totalorder %v3749_v10, %v3442_v57  ;;  %v1204_v44 = vadd.f32 %v1172_v55, %v652_v14  ;;  %v779_v17 = vmul.f32 %v3516_v63, %v3674_v51 }
  0xe1   :  { %v618_v22 = vmul.f32 %v3486_v34, %v3676_v24  ;;  %v698_v8 = vmul.f32 %v3499_v40, %v3676_v24  ;;  %v621_v16 = vmul.f32 %v3486_v34, %v3705_v33  ;;  %v701_v14 = vmul.f32 %v3499_v40, %v3705_v33 }
  0xe2   :  { %v3946_v58 = vpop.permute.xlu1 %587  ;;  %v781_v51 = vmul.f32 %v3516_v63, %v3705_v33  ;;  %v620_v55 = vmul.f32 %v3486_v34, %v3707_v11  ;;  %v3980_v26 = vadd.f32 %v3494_v31, %v696_v47  ;;  %v780_v45 = vmul.f32 %v3516_v63, %v3707_v11 }
  0xe3   :  { %4716 = vst [vmem:[#allocation80_spill] sm:$0xff] %v3946_v58  ;;  %v3948_v27 = vpop.permute.xlu0 %582  ;;  %v3969_v58 = vpop.eup %3030  ;;  %v3992_v20 = vadd.f32 %v3489_v35, %v619_v37  ;;  %v3995_v42 = vadd.f32 %v3494_v31, %v699_v3  ;;  %vm1528_vm2 = vcmp.lt.s32.totalorder %v3749_v10, %v3760_v0  ;;  %v1240_v47 = vmul.f32 1.442695, %v1204_v44 }
  0xe4   :  { %4717 = vst [vmem:[#allocation81_spill] sm:$0xff] %v3948_v27  ;;  %v778_v27 = vmul.f32 %v3516_v63, %v3676_v24  ;;  %4718 = vst [vmem:[#allocation82_spill] sm:$0xff] %v3969_v58  ;;  %v3033_v61 = vpop.eup %3032  ;;  %v816_v24 = vadd.f32 %v3508_v52, %v776_v19  ;;  %v700_v58 = vmul.f32 %v3499_v40, %v3707_v11 }
  0xe5   :  { %v3035_v33 = vpop.eup %3034  ;;  %4721 = vst [vmem:[#allocation85_spill] sm:$0xff] %v3992_v20  ;;  %v1046_v19 = vmul.f32 %v3733_v39, %v814_v53  ;;  %v4001_v11 = vadd.f32 %v3508_v52, %v779_v17  ;;  %v4013_v3 = vadd.f32 %v3489_v35, %v621_v16  ;;  %v4016_v44 = vadd.f32 %v3494_v31, %v701_v14 }
  0xe6   :  { %v3987_v38 = vpop.permute.xlu1 %597  ;;  %v3037_v7 = vpop.eup %3036  ;;  %v4010_v37 = vadd.f32 %v3508_v52, %v778_v27  ;;  %v4019_v39 = vadd.f32 %v3508_v52, %v781_v51  ;;  %v4022_v53 = vadd.f32 %v3489_v35, %v620_v55  ;;  %vm1529_vm3 = vcmp.lt.s32.totalorder %v3749_v10, %v3771_v56 }
  0xe7   :  { %4719 = vst [vmem:[#allocation83_spill] sm:$0xff] %v3987_v38  ;;  %v3989_v1 = vpop.permute.xlu0 %592  ;;  %v4004_v38 = vadd.f32 %v3489_v35, %v618_v22  ;;  %4722 = vst [vmem:[#allocation86_spill] sm:$0xff] %v4013_v3  ;;  %v3039_v17 = vpop.eup %3038  ;;  %v4027_v22 = vadd.f32 %v3494_v31, %v700_v58  ;;  %v4030_v27 = vadd.f32 %v3508_v52, %v780_v45  ;;  %3042 = vpow2.f32 %v1240_v47 }
  0xe8   :  { %4720 = vst [vmem:[#allocation84_spill] sm:$0xff] %v3989_v1  ;;  %v4007_v1 = vadd.f32 %v3494_v31, %v698_v8  ;;  %4723 = vst [vmem:[#allocation87_spill] sm:$0xff] %v4016_v44  ;;  %v1297_v16 = vmul.f32 %v3035_v33, %v3413_v43  ;;  %v1296_v8 = vmul.f32 %v3033_v61, %v3421_v46  ;;  %v3041_v14 = vpop.eup %3040  ;;  %v1141_v44 = vsub.f32 1.0, %v3037_v7 }
  0xe9   :  { %4724 = vst [vmem:[#allocation88_spill] sm:$0xff] %v4022_v53  ;;  %4725 = vst [vmem:[#allocation89_spill] sm:$0xff] %v4027_v22  ;;  %v623_v51 = vmul.f32 %v3486_v34, %v3736_v2  ;;  %v1084_v53 = vmul.f32 1.442695, %v1046_v19  ;;  %v703_v58 = vmul.f32 %v3499_v40, %v3736_v2  ;;  %v783_v45 = vmul.f32 %v3516_v63, %v3736_v2 }
  0xea   :  { %v622_v43 = vmul.f32 %v3486_v34, %v3738_v28  ;;  %v702_v46 = vmul.f32 %v3499_v40, %v3738_v28  ;;  %v1173_v61 = vmul.f32 %v1141_v44, %v3912_v5  ;;  %v1298_v2 = vmul.f32 %v3039_v17, %v3426_v48  ;;  %v4727_v44 = vld [vmem:[#allocation43_spill] sm:$0xff]  ;;  %v4730_v48 = vld [vmem:[#allocation37_spill] sm:$0xff] }
  0xeb   :  { %v1334_v55 = vpop.permute.xlu1 %1333  ;;  %v1330_v3 = vpop.permute.xlu0 %1329  ;;  %3044 = vpow2.f32 %v1084_v53  ;;  %v1299_v47 = vmul.f32 %v3041_v14, %v3435_v54  ;;  %v4054_v34 = vadd.f32 %v3489_v35, %v623_v51  ;;  %v782_v40 = vmul.f32 %v3516_v63, %v3738_v28 }
  0xec   :  { %v1457_v22 = vmul.f32 %v1334_v55, %v1297_v16  ;;  %v1456_v20 = vmul.f32 %v1330_v3, %v1296_v8  ;;  %v1205_v3 = vadd.f32 %v1173_v61, %v3909_v62  ;;  %v1047_v53 = vmul.f32 %v4727_v44, %v3924_v21  ;;  %v4732_v62 = vld [vmem:[#allocation48_spill] sm:$0xff]  ;;  %v4734_v61 = vld [vmem:[#allocation47_spill] sm:$0xff] }
  0xed   :  { %4726 = vst [vmem:[#allocation90_spill] sm:$0xff] %v4054_v34  ;;  %v4067_v8 = vadd.f32 %v3508_v52, %v783_v45  ;;  %v4070_v51 = vadd.f32 %v3489_v35, %v622_v43  ;;  %v4733_v55 = vld [vmem:[#allocation24_spill] sm:$0xff]  ;;  %v1048_v44 = vmul.f32 %v4734_v61, %v816_v24  ;;  %v785_v45 = vmul.f32 %v4730_v48, %v4732_v62 }
  0xee   :  { %v1575_v7 = vsel %vm1527_vm0, %v1457_v22, 0.0  ;;  %v1574_v33 = vsel %vm1526_vm1, %v1456_v20, 0.0  ;;  %v4062_v22 = vadd.f32 %v3494_v31, %v703_v58  ;;  %v4729_v20 = vld [vmem:[#allocation49_spill] sm:$0xff]  ;;  %v1242_v63 = vmul.f32 1.442695, %v1205_v3 }
  0xef   :  { %v1338_v5 = vpop.permute.xlu1 %1337  ;;  %v1342_v19 = vpop.permute.xlu0 %1341  ;;  %v784_v17 = vmul.f32 %v4730_v48, %v4729_v20  ;;  %v1608_v14 = vadd.f32 %v1575_v7, %v1574_v33  ;;  %v1086_v28 = vmul.f32 1.442695, %v1047_v53  ;;  %4731 = vst [vmem:[#allocation49_spill] sm:$0xff] %v4070_v51  ;;  %v625_v21 = vmul.f32 %v4733_v55, %v4732_v62 }
  0xf0   :  { %4728 = vst [vmem:[#allocation43_spill] sm:$0xff] %v4062_v22  ;;  %v1458_v54 = vmul.f32 %v1338_v5, %v1298_v2  ;;  %v1459_v16 = vmul.f32 %v1342_v19, %v1299_v47  ;;  %v4735_v2 = vld [vmem:[#allocation33_spill] sm:$0xff]  ;;  %3046 = vpow2.f32 %v1242_v63  ;;  %v4083_v35 = vadd.f32 %v3494_v31, %v702_v46  ;;  %v4736_v31 = vld [vmem:[#allocation36_spill] sm:$0xff] }
  0xf1   :  { %v705_v47 = vmul.f32 %v4735_v2, %v4732_v62  ;;  %v824_v43 = vadd.f32 %v3852_v32, %v784_v17  ;;  %3048 = vpow2.f32 %v1086_v28  ;;  %v624_v24 = vmul.f32 %v4733_v55, %v4729_v20  ;;  %v4745_v22 = vld [vmem:[#allocation40_spill] sm:$0xff] }
  0xf2   :  { %v1576_v58 = vsel %vm1528_vm2, %v1458_v54, 0.0  ;;  %v1577_v5 = vsel %vm1529_vm3, %v1459_v16, 0.0  ;;  %v704_v19 = vmul.f32 %v4735_v2, %v4729_v20  ;;  %v1088_v53 = vmul.f32 1.442695, %v1048_v44  ;;  %v4741_v44 = vld [vmem:[#allocation39_spill] sm:$0xff] }
  0xf3   :  { %v1609_v7 = vadd.f32 %v1608_v14, %v1576_v58  ;;  %v1346_v33 = vpop.permute.xlu1 %1345  ;;  %v4096_v54 = vadd.f32 %v3508_v52, %v782_v40  ;;  %v4099_v46 = vadd.f32 %v4736_v31, %v625_v21  ;;  %v627_v17 = vmul.f32 %v4733_v55, %v3790_v6  ;;  %v4737_v14 = vld [vmem:[#allocation38_spill] sm:$0xff]  ;;  %v4739_v52 = vld [vmem:[#allocation51_spill] sm:$0xff] }
  0xf4   :  { %v707_v16 = vmul.f32 %v4735_v2, %v3790_v6  ;;  %vm1530_vm4 = vcmp.lt.s32.totalorder %v3749_v10, %v3786_v36  ;;  %v4108_v20 = vadd.f32 %v4737_v14, %v705_v47  ;;  %v825_v63 = vadd.f32 %v3852_v32, %v785_v45  ;;  %v3043_v62 = vpop.eup %3042  ;;  %v4740_v58 = vld [vmem:[#allocation54_spill] sm:$0xff]  ;;  %v4742_v47 = vld [vmem:[#allocation55_spill] sm:$0xff]  ;;  %v4755_v36 = vld [vmem:[#allocation77_spill] sm:$0xff] }
  0xf5   :  { %v4093_v3 = vadd.f32 %v1609_v7, %v1577_v5  ;;  %3050 = vpow2.f32 %v1088_v53  ;;  %v1049_v40 = vmul.f32 %v4739_v52, %v3942_v30  ;;  %v787_v21 = vmul.f32 %v4730_v48, %v3790_v6 }
  0xf6   :  { %v786_v61 = vmul.f32 %v4730_v48, %v4740_v58  ;;  %v1056_v7 = vmul.f32 %v4741_v44, %v824_v43  ;;  %v1050_v5 = vmul.f32 %v4742_v47, %v4010_v37  ;;  %v4123_v45 = vadd.f32 %v4736_v31, %v624_v24  ;;  %v4743_v24 = vld [vmem:[#allocation9_spill] sm:$0xff] }
  0xf7   :  { %v4111_v28 = vpop.permute.xlu1 %1397  ;;  %v4126_v53 = vadd.f32 %v4737_v14, %v704_v19  ;;  %v626_v30 = vmul.f32 %v4733_v55, %v4740_v58  ;;  %v1090_v52 = vmul.f32 1.442695, %v1049_v40  ;;  %v4131_v6 = vadd.f32 %v4736_v31, %v627_v17 }
  0xf8   :  { %4738 = vst [vmem:[#allocation37_spill] sm:$0xff] %v4111_v28  ;;  %v3045_v56 = vpop.eup %3044  ;;  %v4134_v0 = vadd.f32 %v4737_v14, %v707_v16  ;;  %v706_v37 = vmul.f32 %v4735_v2, %v4740_v58  ;;  %v629_v43 = vmul.f32 %v4733_v55, %v3814_v29  ;;  %vm1531_vm5 = vcmp.lt.s32.totalorder %v3749_v10, %v3824_v49 }
  0xf9   :  { %v1300_v19 = vmul.f32 %v3043_v62, %v4743_v24  ;;  %v1142_v40 = vsub.f32 1.0, %v3045_v56  ;;  %3052 = vpow2.f32 %v1090_v52  ;;  %v1092_v17 = vmul.f32 1.442695, %v1050_v5 }
  0xfa   :  { %v827_v47 = vadd.f32 %v3852_v32, %v787_v21  ;;  %v826_v16 = vadd.f32 %v3852_v32, %v786_v61  ;;  %v709_v58 = vmul.f32 %v4735_v2, %v3814_v29  ;;  %v1104_v18 = vmul.f32 1.442695, %v1056_v7 }
  0xfb   :  { %v4143_v44 = vpop.permute.xlu1 %1405  ;;  %v4150_v34 = vadd.f32 %v4736_v31, %v626_v30  ;;  %v1460_v28 = vmul.f32 %v1346_v33, %v1300_v19  ;;  %v1057_v51 = vmul.f32 %v4745_v22, %v825_v63  ;;  %v1174_v62 = vmul.f32 %v1142_v40, %v3930_v41  ;;  %v4748_v40 = vld [vmem:[#allocation10_spill] sm:$0xff] }
  0xfc   :  { %4744 = vst [vmem:[#allocation48_spill] sm:$0xff] %v4143_v44  ;;  %v4155_v56 = vadd.f32 %v4737_v14, %v706_v37  ;;  %v789_v21 = vmul.f32 %v4730_v48, %v3814_v29  ;;  %v628_v61 = vmul.f32 %v4733_v55, %v3816_v50  ;;  %v708_v7 = vmul.f32 %v4735_v2, %v3816_v50  ;;  %v4746_v29 = vld [vmem:[#allocation41_spill] sm:$0xff]  ;;  %v4747_v37 = vld [vmem:[#allocation56_spill] sm:$0xff] }
  0xfd   :  { %v4164_v5 = vadd.f32 %v4736_v31, %v629_v43  ;;  %v788_v22 = vmul.f32 %v4730_v48, %v3816_v50  ;;  %v1206_v41 = vadd.f32 %v1174_v62, %v3927_v23  ;;  %3054 = vpow2.f32 %v1092_v17  ;;  %v3047_v33 = vpop.eup %3046 }
  0xfe   :  { %v4170_v63 = vadd.f32 %v4737_v14, %v709_v58  ;;  %3056 = vpow2.f32 %v1104_v18  ;;  %v1058_v30 = vmul.f32 %v4746_v29, %v826_v16  ;;  %v1051_v24 = vmul.f32 %v4747_v37, %v4001_v11  ;;  %v3049_v19 = vpop.eup %3048 }
  0xff   :  { %v1350_v52 = vpop.permute.xlu1 %1349  ;;  %v1578_v43 = vsel %vm1530_vm4, %v1460_v28, 0.0  ;;  %v1106_v50 = vmul.f32 1.442695, %v1057_v51  ;;  %v1301_v23 = vmul.f32 %v3047_v33, %v4748_v40  ;;  %v1244_v17 = vmul.f32 1.442695, %v1206_v41 }
 0x100   :  { %v4180_v62 = vadd.f32 %v3852_v32, %v789_v21  ;;  %v4183_v18 = vadd.f32 %v4736_v31, %v628_v61  ;;  %v4186_v16 = vadd.f32 %v4737_v14, %v708_v7  ;;  %v1143_v58 = vsub.f32 1.0, %v3049_v19 }
 0x101   :  { %v631_v11 = vmul.f32 %v4733_v55, %v3841_v60  ;;  %v711_v28 = vmul.f32 %v4735_v2, %v3841_v60  ;;  %v1461_v51 = vmul.f32 %v1350_v52, %v1301_v23  ;;  %3058 = vpow2.f32 %v1244_v17 }
 0x102   :  { %v3051_v33 = vpop.eup %3050  ;;  %v791_v21 = vmul.f32 %v4730_v48, %v3841_v60  ;;  %v1611_v41 = vadd.f32 %v4093_v3, %v1578_v43  ;;  %v1175_v61 = vmul.f32 %v1143_v58, %v3921_v13  ;;  %v1094_v29 = vmul.f32 1.442695, %v1051_v24 }
 0x103   :  { %3060 = vpow2.f32 %v1106_v50  ;;  %v1108_v7 = vmul.f32 1.442695, %v1058_v30  ;;  %v1579_v37 = vsel %vm1531_vm5, %v1461_v51, 0.0  ;;  %v1144_v19 = vsub.f32 1.0, %v3051_v33  ;;  %v4749_v50 = vld [vmem:[#allocation42_spill] sm:$0xff] }
 0x104   :  { %v828_v40 = vadd.f32 %v3852_v32, %v788_v22  ;;  %v630_v52 = vmul.f32 %v4733_v55, %v3843_v12  ;;  %v4202_v23 = vadd.f32 %v1611_v41, %v1579_v37  ;;  %v1207_v60 = vadd.f32 %v1175_v61, %v3918_v59 }
 0x105   :  { %v4206_v3 = vadd.f32 %v4736_v31, %v631_v11  ;;  %v710_v13 = vmul.f32 %v4735_v2, %v3843_v12  ;;  %v790_v30 = vmul.f32 %v4730_v48, %v3843_v12  ;;  %v1176_v24 = vmul.f32 %v1144_v19, %v3980_v26 }
 0x106   :  { %v3053_v43 = vpop.eup %3052  ;;  %v4214_v22 = vadd.f32 %v4737_v14, %v711_v28  ;;  %v1059_v17 = vmul.f32 %v4749_v50, %v827_v47  ;;  %v1246_v58 = vmul.f32 1.442695, %v1207_v60  ;;  %3062 = vpow2.f32 %v1094_v29  ;;  %v4751_v60 = vld [vmem:[#allocation63_spill] sm:$0xff] }
 0x107   :  { %v4218_v59 = vadd.f32 %v3852_v32, %v791_v21  ;;  %3064 = vpow2.f32 %v1108_v7  ;;  %v1208_v11 = vadd.f32 %v1176_v24, %v3951_v15  ;;  %v1145_v51 = vsub.f32 1.0, %v3053_v43  ;;  %v4750_v7 = vld [vmem:[#allocation76_spill] sm:$0xff]  ;;  %v4754_v43 = vld [vmem:[#allocation45_spill] sm:$0xff] }
 0x108   :  { %v4222_v33 = vadd.f32 %v4736_v31, %v630_v52  ;;  %v633_v12 = vmul.f32 %v4733_v55, %v3876_v9  ;;  %3066 = vpow2.f32 %v1246_v58  ;;  %v1052_v26 = vmul.f32 %v3812_v25, %v4030_v27  ;;  %v1354_v25 = vpop.permute.xlu1 %1353 }
 0x109   :  { %v713_v47 = vmul.f32 %v4735_v2, %v3876_v9  ;;  %v793_v28 = vmul.f32 %v4730_v48, %v3876_v9  ;;  %v1248_v21 = vmul.f32 1.442695, %v1208_v11  ;;  %v1177_v15 = vmul.f32 %v1145_v51, %v3939_v4  ;;  %v4752_v4 = vld [vmem:[#allocation79_spill] sm:$0xff] }
 0x10a   :  { %v3055_v41 = vpop.eup %3054  ;;  %v4234_v61 = vadd.f32 %v4737_v14, %v710_v13  ;;  %v830_v29 = vadd.f32 %v3852_v32, %v790_v30  ;;  %v632_v37 = vmul.f32 %v4733_v55, %v4750_v7  ;;  %v1110_v19 = vmul.f32 1.442695, %v1059_v17 }
 0x10b   :  { %v3057_v27 = vpop.eup %3056  ;;  %v712_v52 = vmul.f32 %v4735_v2, %v4750_v7  ;;  %v792_v9 = vmul.f32 %v4730_v48, %v4750_v7  ;;  %vm1532_vm6 = vcmp.lt.s32.totalorder %v3749_v10, %v4751_v60  ;;  %v1209_v13 = vadd.f32 %v1177_v15, %v4752_v4  ;;  %v4769_v60 = vld [vmem:[#allocation80_spill] sm:$0xff] }
 0x10c   :  { %v1146_v24 = vsub.f32 1.0, %v3055_v41  ;;  %v4247_v30 = vadd.f32 %v4736_v31, %v633_v12  ;;  %v1060_v50 = vmul.f32 %v4754_v43, %v828_v40  ;;  %3068 = vpow2.f32 %v1248_v21  ;;  %v4756_v40 = vld [vmem:[#allocation53_spill] sm:$0xff]  ;;  %v4759_v43 = vld [vmem:[#allocation58_spill] sm:$0xff] }
 0x10d   :  { %v1096_v17 = vmul.f32 1.442695, %v1052_v26  ;;  %v4251_v58 = vadd.f32 %v4737_v14, %v713_v47  ;;  %v4254_v11 = vadd.f32 %v3852_v32, %v793_v28  ;;  %v1250_v51 = vmul.f32 1.442695, %v1209_v13  ;;  %v4757_v28 = vld [vmem:[#allocation65_spill] sm:$0xff] }
 0x10e   :  { %4753 = vst [vmem:[#allocation24_spill] sm:$0xff] %v4247_v30  ;;  %v1178_v7 = vmul.f32 %v1146_v24, %v4007_v1  ;;  %v3059_v49 = vpop.eup %3058  ;;  %v635_v15 = vmul.f32 %v4733_v55, %v4755_v36  ;;  %v715_v12 = vmul.f32 %v4735_v2, %v4755_v36  ;;  %3070 = vpow2.f32 %v1110_v19  ;;  %v4758_v13 = vld [vmem:[#allocation13_spill] sm:$0xff]  ;;  %v1358_v19 = vpop.permute.xlu1 %1357  ;;  %v4762_v30 = vld [vmem:[#allocation67_spill] sm:$0xff] }
 0x10f   :  { %v1061_v26 = vmul.f32 %v4756_v40, %v4180_v62  ;;  %v795_v47 = vmul.f32 %v4730_v48, %v4755_v36  ;;  %v1152_v21 = vsub.f32 1.0, %v3057_v27  ;;  %vm1533_vm7 = vcmp.lt.s32.totalorder %v3749_v10, %v4757_v28  ;;  %v4760_v40 = vld [vmem:[#allocation78_spill] sm:$0xff] }
 0x110   :  { %3072 = vpow2.f32 %v1250_v51  ;;  %v1210_v1 = vadd.f32 %v1178_v7, %v4004_v38  ;;  %v3061_v41 = vpop.eup %3060  ;;  %v1112_v4 = vmul.f32 1.442695, %v1060_v50  ;;  %v1302_v24 = vmul.f32 %v3059_v49, %v4758_v13 }
 0x111   :  { %v1062_v44 = vmul.f32 %v4759_v43, %v830_v29  ;;  %3074 = vpow2.f32 %v1096_v17  ;;  %v4271_v62 = vadd.f32 %v4736_v31, %v632_v37  ;;  %v634_v36 = vmul.f32 %v4733_v55, %v4760_v40 }
 0x112   :  { %v714_v27 = vmul.f32 %v4735_v2, %v4760_v40  ;;  %v1252_v51 = vmul.f32 1.442695, %v1210_v1  ;;  %v4278_v38 = vadd.f32 %v4737_v14, %v712_v52  ;;  %v832_v50 = vadd.f32 %v3852_v32, %v792_v9 }
 0x113   :  { %v1114_v49 = vmul.f32 1.442695, %v1061_v26  ;;  %v1462_v7 = vmul.f32 %v1354_v25, %v1302_v24  ;;  %v3063_v29 = vpop.eup %3062  ;;  %v4282_v17 = vadd.f32 %v4736_v31, %v635_v15  ;;  %v794_v37 = vmul.f32 %v4730_v48, %v4760_v40  ;;  %v4767_v40 = vld [vmem:[#allocation69_spill] sm:$0xff] }
 0x114   :  { %v1184_v13 = vmul.f32 %v1152_v21, %v4126_v53  ;;  %v1153_v43 = vsub.f32 1.0, %v3061_v41  ;;  %vm1534_vm8 = vcmp.lt.s32.totalorder %v3749_v10, %v4762_v30  ;;  %v3065_v1 = vpop.eup %3064  ;;  %v4290_v52 = vadd.f32 %v4737_v14, %v715_v12  ;;  %v4765_v21 = vld [vmem:[#allocation16_spill] sm:$0xff] }
 0x115   :  { %4761 = vst [vmem:[#allocation47_spill] sm:$0xff] %v4282_v17  ;;  %v4293_v9 = vadd.f32 %v3852_v32, %v795_v47  ;;  %3076 = vpow2.f32 %v1112_v4  ;;  %v1116_v25 = vmul.f32 1.442695, %v1062_v44  ;;  %v3067_v15 = vpop.eup %3066  ;;  %v4296_v26 = vadd.f32 %v4736_v31, %v634_v36  ;;  %v4766_v47 = vld [vmem:[#allocation59_spill] sm:$0xff]  ;;  %v1362_v44 = vpop.permute.xlu1 %1361 }
 0x116   :  { %4763 = vst [vmem:[#allocation33_spill] sm:$0xff] %v4290_v52  ;;  %v4299_v24 = vadd.f32 %v4737_v14, %v714_v27  ;;  %3078 = vpow2.f32 %v1252_v51  ;;  %v1147_v53 = vsub.f32 1.0, %v3063_v29  ;;  %v1580_v12 = vsel %vm1532_vm6, %v1462_v7, 0.0 }
 0x117   :  { %4764 = vst [vmem:[#allocation36_spill] sm:$0xff] %v4296_v26  ;;  %3080 = vpow2.f32 %v1114_v49  ;;  %v1303_v41 = vmul.f32 %v3067_v15, %v4765_v21  ;;  %v1063_v4 = vmul.f32 %v4766_v47, %v4218_v59  ;;  %vm1535_vm9 = vcmp.lt.s32.totalorder %v3749_v10, %v4767_v40  ;;  %v4768_v49 = vld [vmem:[#allocation60_spill] sm:$0xff]  ;;  %v4316_v15 = vpop.permute.xlu0 %1393  ;;  %v4770_v26 = vld [vmem:[#allocation62_spill] sm:$0xff] }
 0x118   :  { %v1216_v36 = vadd.f32 %v1184_v13, %v4123_v45  ;;  %v1185_v27 = vmul.f32 %v1153_v43, %v4108_v20  ;;  %v1179_v51 = vmul.f32 %v1147_v53, %v3995_v42  ;;  %v1053_v29 = vmul.f32 %v4768_v49, %v4019_v39  ;;  %v4771_v13 = vld [vmem:[#allocation85_spill] sm:$0xff]  ;;  %v4772_v49 = vld [vmem:[#allocation18_spill] sm:$0xff] }
 0x119   :  { %v797_v7 = vmul.f32 %v4730_v48, %v4769_v60  ;;  %v1154_v21 = vsub.f32 1.0, %v3065_v1  ;;  %3082 = vpow2.f32 %v1116_v25  ;;  %v1463_v59 = vmul.f32 %v1358_v19, %v1303_v41  ;;  %v3069_v47 = vpop.eup %3068 }
 0x11a   :  { %v1613_v17 = vadd.f32 %v4202_v23, %v1580_v12  ;;  %v1064_v45 = vmul.f32 %v4770_v26, %v832_v50  ;;  %v1211_v20 = vadd.f32 %v1179_v51, %v4771_v13  ;;  %v1098_v43 = vmul.f32 1.442695, %v1053_v29  ;;  %v4773_v50 = vld [vmem:[#allocation81_spill] sm:$0xff]  ;;  %v1366_v29 = vpop.permute.xlu1 %1365 }
 0x11b   :  { %v834_v42 = vadd.f32 %v3852_v32, %v794_v37  ;;  %v1581_v39 = vsel %vm1533_vm7, %v1463_v59, 0.0  ;;  %v1118_v53 = vmul.f32 1.442695, %v1063_v4  ;;  %v1304_v52 = vmul.f32 %v3069_v47, %v4772_v49  ;;  %v3071_v1 = vpop.eup %3070  ;;  %v4774_v47 = vld [vmem:[#allocation19_spill] sm:$0xff] }
 0x11c   :  { %v1264_v25 = vmul.f32 1.442695, %v1216_v36  ;;  %v1217_v19 = vadd.f32 %v1185_v27, %v4099_v46  ;;  %v1614_v41 = vadd.f32 %v1613_v17, %v1581_v39  ;;  %v1254_v23 = vmul.f32 1.442695, %v1211_v20  ;;  %v4332_v36 = vpop.permute.xlu0 %1401  ;;  %v4775_v17 = vld [vmem:[#allocation64_spill] sm:$0xff] }
 0x11d   :  { %v3073_v12 = vpop.eup %3072  ;;  %v796_v26 = vmul.f32 %v4730_v48, %v4773_v50  ;;  %v1186_v51 = vmul.f32 %v1154_v21, %v4155_v56  ;;  %v1464_v37 = vmul.f32 %v1362_v44, %v1304_v52  ;;  %3084 = vpow2.f32 %v1098_v43  ;;  %v4776_v21 = vld [vmem:[#allocation66_spill] sm:$0xff]  ;;  %v4777_v39 = vld [vmem:[#allocation72_spill] sm:$0xff] }
 0x11e   :  { %v3075_v13 = vpop.eup %3074  ;;  %v837_v4 = vadd.f32 %v3852_v32, %v797_v7  ;;  %v1120_v59 = vmul.f32 1.442695, %v1064_v45  ;;  %v1305_v49 = vmul.f32 %v3073_v12, %v4774_v47  ;;  %3086 = vpow2.f32 %v1254_v23 }
 0x11f   :  { %3088 = vpow2.f32 %v1118_v53  ;;  %v1582_v46 = vsel %vm1534_vm8, %v1464_v37, 0.0  ;;  %v1065_v56 = vmul.f32 %v4775_v17, %v4254_v11  ;;  %v1148_v52 = vsub.f32 1.0, %v3075_v13  ;;  %v4778_v53 = vld [vmem:[#allocation89_spill] sm:$0xff] }
 0x120   :  { %3090 = vpow2.f32 %v1264_v25  ;;  %v1266_v44 = vmul.f32 1.442695, %v1217_v19  ;;  %v1465_v27 = vmul.f32 %v1366_v29, %v1305_v49  ;;  %v1066_v7 = vmul.f32 %v4776_v21, %v834_v42  ;;  %v4779_v42 = vld [vmem:[#allocation68_spill] sm:$0xff]  ;;  %v3154_v17 = vld [vmem:[%s3227_s7 + $0x3] ss:$0 sm:$0xff] }
 0x121   :  { %v1218_v45 = vadd.f32 %v1186_v51, %v4150_v34  ;;  %v1155_v20 = vsub.f32 1.0, %v3071_v1  ;;  %v1615_v43 = vadd.f32 %v1614_v41, %v1582_v46  ;;  %vm1536_vm10 = vcmp.lt.s32.totalorder %v3749_v10, %v4777_v39  ;;  %v4780_v41 = vld [vmem:[#allocation73_spill] sm:$0xff]  ;;  %v4781_v29 = vld [vmem:[#allocation88_spill] sm:$0xff] }
 0x122   :  { %v1180_v23 = vmul.f32 %v1148_v52, %v4778_v53  ;;  %v3077_v12 = vpop.eup %3076  ;;  %v836_v37 = vadd.f32 %v3852_v32, %v796_v26  ;;  %3092 = vpow2.f32 %v1120_v59  ;;  %v1583_v11 = vsel %vm1535_vm9, %v1465_v27, 0.0  ;;  %v4782_v26 = vld [vmem:[#allocation82_spill] sm:$0xff]  ;;  %v1370_v53 = vpop.permute.xlu1 %1369 }
 0x123   :  { %v1054_v25 = vmul.f32 %v4779_v42, %v4096_v54  ;;  %v3079_v34 = vpop.eup %3078  ;;  %v4350_v1 = vadd.f32 %v1615_v43, %v1583_v11  ;;  %v1122_v19 = vmul.f32 1.442695, %v1065_v56  ;;  %v1067_v51 = vmul.f32 %v4780_v41, %v4293_v9  ;;  %v4783_v52 = vld [vmem:[#allocation70_spill] sm:$0xff]  ;;  %v4362_v43 = vpop.permute.xlu0 %1409  ;;  %v4786_v11 = vld [vmem:[#allocation21_spill] sm:$0xff] }
 0x124   :  { %v1212_v13 = vadd.f32 %v1180_v23, %v4781_v29  ;;  %v3081_v47 = vpop.eup %3080  ;;  %v1124_v49 = vmul.f32 1.442695, %v1066_v7  ;;  %v1035_v59 = vmul.f32 0.6931472, %v4782_v26  ;;  %v4784_v27 = vand.u32 2147483647, %v4783_v52 }
 0x125   :  { %v1100_v46 = vmul.f32 1.442695, %v1054_v25  ;;  %3094 = vpow2.f32 %v1266_v44  ;;  %v1268_v54 = vmul.f32 1.442695, %v1218_v45  ;;  %v1187_v56 = vmul.f32 %v1155_v20, %v4134_v0  ;;  %v4785_v23 = vld [vmem:[#allocation74_spill] sm:$0xff]  ;;  %v4787_v25 = vld [vmem:[#allocation75_spill] sm:$0xff] }
 0x126   :  { %v4359_v21 = vmul.f32 %v3154_v17, %v4784_v27  ;;  %v1156_v9 = vsub.f32 1.0, %v3077_v12  ;;  %vm1537_vm11 = vcmp.lt.s32.totalorder %v3749_v10, %v4785_v23  ;;  %v3083_v7 = vpop.eup %3082  ;;  %v1306_v42 = vmul.f32 %v3079_v34, %v4786_v11  ;;  %v871_v26 = vld [vmem:[%s3232_s10 + $0xf8] sm:$0xff] }
 0x127   :  { %v1068_v41 = vmul.f32 %v4787_v25, %v836_v37  ;;  %3096 = vpow2.f32 %v1100_v46  ;;  %v1157_v44 = vsub.f32 1.0, %v3081_v47  ;;  %v1126_v45 = vmul.f32 1.442695, %v1067_v51  ;;  %v4788_v12 = vld [vmem:[#allocation71_spill] sm:$0xff]  ;;  %v4374_v51 = vpop.permute.xlu0 %1413 }
 0x128   :  { %v974_v29 = vmax.f32 %v4359_v21, 1e-30  ;;  %3098 = vpow2.f32 %v1122_v19  ;;  %v1256_v0 = vmul.f32 1.442695, %v1212_v13  ;;  %v1466_v20 = vmul.f32 %v1370_v53, %v1306_v42  ;;  %v1374_v13 = vpop.permute.xlu1 %1373 }
 0x129   :  { %v1069_v52 = vmul.f32 %v1035_v59, %v837_v4  ;;  %v1055_v27 = vmul.f32 %v4788_v12, %v4067_v8  ;;  %v1219_v40 = vadd.f32 %v1187_v56, %v4131_v6  ;;  %v1158_v34 = vsub.f32 1.0, %v3083_v7  ;;  %v4789_v56 = vld [vmem:[#allocation22_spill] sm:$0xff]  ;;  %v4790_v7 = vld [vmem:[#allocation87_spill] sm:$0xff] }
 0x12a   :  { %3100 = vlog2.f32 %v974_v29  ;;  %v903_v11 = vand.u32 2147483647, %v871_v26  ;;  %v3085_v37 = vpop.eup %3084  ;;  %v1188_v46 = vmul.f32 %v1156_v9, %v4186_v16  ;;  %v1128_v25 = vmul.f32 1.442695, %v1068_v41 }
 0x12b   :  { %3102 = vpow2.f32 %v1268_v54  ;;  %v1102_v47 = vmul.f32 1.442695, %v1055_v27  ;;  %v3087_v19 = vpop.eup %3086  ;;  %v1189_v4 = vmul.f32 %v1157_v44, %v4170_v63  ;;  %v1149_v59 = vsub.f32 1.0, %v3085_v37 }
 0x12c   :  { %3104 = vpow2.f32 %v1124_v49  ;;  %v4377_v8 = vmul.f32 %v3154_v17, %v903_v11  ;;  %v3089_v54 = vpop.eup %3088  ;;  %v1584_v6 = vsel %vm1536_vm10, %v1466_v20, 0.0  ;;  %v1307_v16 = vmul.f32 %v3087_v19, %v4789_v56  ;;  %v4791_v20 = vld [vmem:[#allocation86_spill] sm:$0xff] }
 0x12d   :  { %3106 = vpow2.f32 %v1256_v0  ;;  %v1130_v49 = vmul.f32 1.442695, %v1069_v52  ;;  %v3091_v9 = vpop.eup %3090  ;;  %v1190_v53 = vmul.f32 %v1158_v34, %v4234_v61  ;;  %v1181_v42 = vmul.f32 %v1149_v59, %v4790_v7  ;;  %v4792_v52 = vld [vmem:[#allocation84_spill] sm:$0xff]  ;;  %v4396_v34 = vpop.permute.xlu0 %1417 }
 0x12e   :  { %3108 = vpow2.f32 %v1126_v45  ;;  %v975_v63 = vmax.f32 %v4377_v8, 1e-30  ;;  %v1270_v41 = vmul.f32 1.442695, %v1219_v40  ;;  %v1220_v17 = vadd.f32 %v1188_v46, %v4183_v18  ;;  %v4793_v18 = vld [vmem:[#allocation11_spill] sm:$0xff] }
 0x12f   :  { %3110 = vpow2.f32 %v1102_v47  ;;  %v1467_v29 = vmul.f32 %v1374_v13, %v1307_v16  ;;  %v3093_v26 = vpop.eup %3092  ;;  %v1159_v44 = vsub.f32 1.0, %v3089_v54  ;;  %v1617_v0 = vadd.f32 %v4350_v1, %v1584_v6 }
 0x130   :  { %3112 = vpow2.f32 %v1128_v25  ;;  %v1213_v45 = vadd.f32 %v1181_v42, %v4791_v20  ;;  %v798_v61 = vmul.f32 %v4730_v48, %v4792_v52  ;;  %v1221_v12 = vadd.f32 %v1189_v4, %v4164_v5 }
 0x131   :  { %3114 = vlog2.f32 %v975_v63  ;;  %v1585_v40 = vsel %vm1537_vm11, %v1467_v29, 0.0  ;;  %v1312_v27 = vmul.f32 %v3091_v9, %v4793_v18  ;;  %v1222_v11 = vadd.f32 %v1190_v53, %v4222_v33 }
 0x132   :  { %3116 = vpow2.f32 %v1130_v49  ;;  %v4399_v1 = vadd.f32 %v1617_v0, %v1585_v40  ;;  %v1258_v37 = vmul.f32 1.442695, %v1213_v45  ;;  %v3095_v46 = vpop.eup %3094  ;;  %v4403_v25 = vmul.f32 %v4733_v55, %v4769_v60  ;;  %v4795_v45 = vld [vmem:[#allocation49_spill] sm:$0xff] }
 0x133   :  { %v717_v5 = vmul.f32 %v4735_v2, %v4769_v60  ;;  %3118 = vpow2.f32 %v1270_v41  ;;  %v1272_v47 = vmul.f32 1.442695, %v1220_v17  ;;  %v636_v4 = vmul.f32 %v4733_v55, %v4773_v50  ;;  %v4794_v60 = vld [vmem:[#allocation83_spill] sm:$0xff] }
 0x134   :  { %v3097_v19 = vpop.eup %3096  ;;  %v716_v33 = vmul.f32 %v4735_v2, %v4773_v50  ;;  %v1191_v13 = vmul.f32 %v1159_v44, %v4214_v22  ;;  %3120 = vpow2.f32 %v1258_v37  ;;  %v838_v54 = vadd.f32 %v3852_v32, %v798_v61 }
 0x135   :  { %v3099_v59 = vpop.eup %3098  ;;  %v1274_v6 = vmul.f32 1.442695, %v1221_v12  ;;  %v1160_v56 = vsub.f32 1.0, %v3093_v26  ;;  %v1150_v16 = vsub.f32 1.0, %v3097_v19  ;;  %v799_v9 = vmul.f32 %v4730_v48, %v4794_v60  ;;  %v4427_v26 = vpop.permute.xlu0 %1421 }
 0x136   :  { %v1472_v53 = vmul.f32 %v4316_v15, %v1312_v27  ;;  %v1276_v7 = vmul.f32 1.442695, %v1222_v11  ;;  %v4417_v42 = vadd.s32 96, %v3442_v57  ;;  %v4420_v22 = vadd.f32 %v4737_v14, %v717_v5  ;;  %v4796_v27 = vld [vmem:[#allocation12_spill] sm:$0xff] }
 0x137   :  { %v3101_v49 = vpop.eup %3100  ;;  %3122 = vpow2.f32 %v1272_v47  ;;  %v1182_v63 = vmul.f32 %v1150_v16, %v4083_v35  ;;  %v4424_v29 = vadd.f32 %v4736_v31, %v636_v4  ;;  %v756_v48 = vadd.f32 %v4737_v14, %v716_v33  ;;  %v4797_v33 = vld [vmem:[#allocation25_spill] sm:$0xff] }
 0x138   :  { %v3103_v50 = vpop.eup %3102  ;;  %v1037_v41 = vmul.f32 0.6931472, %v3101_v49  ;;  %v1223_v15 = vadd.f32 %v1191_v13, %v4206_v3  ;;  %v1161_v44 = vsub.f32 1.0, %v3099_v59  ;;  %3124 = vpow2.f32 %v1274_v6  ;;  %v4798_v6 = vld [vmem:[#allocation14_spill] sm:$0xff] }
 0x139   :  { %v3105_v17 = vpop.eup %3104  ;;  %v1192_v20 = vmul.f32 %v1160_v56, %v4278_v38  ;;  %v1214_v61 = vadd.f32 %v1182_v63, %v4795_v45  ;;  %v839_v40 = vadd.f32 %v3852_v32, %v799_v9  ;;  %v4436_v18 = vsel %vm1526_vm1, %v1472_v53, 0.0  ;;  %v1378_v38 = vpop.permute.xlu1 %1377  ;;  %v4802_v45 = vld [vmem:[#allocation90_spill] sm:$0xff] }
 0x13a   :  { %v3107_v0 = vpop.eup %3106  ;;  %v1070_v12 = vmul.f32 %v1037_v41, %v838_v54  ;;  %3126 = vpow2.f32 %v1276_v7  ;;  %vm1538_vm12 = vcmp.lt.s32.totalorder %v3749_v10, %v4417_v42  ;;  %v1313_v11 = vmul.f32 %v3095_v46, %v4796_v27  ;;  %v4445_v46 = vpop.permute.xlu0 %1425  ;;  %v4799_v7 = vld [vmem:[#allocation43_spill] sm:$0xff] }
 0x13b   :  { %v3109_v35 = vpop.eup %3108  ;;  %v1162_v37 = vsub.f32 1.0, %v3105_v17  ;;  %v1260_v5 = vmul.f32 1.442695, %v1214_v61  ;;  %v1278_v4 = vmul.f32 1.442695, %v1223_v15  ;;  %v1193_v32 = vmul.f32 %v1161_v44, %v4251_v58  ;;  %v4800_v17 = vld [vmem:[#allocation37_spill] sm:$0xff] }
 0x13c   :  { %v3111_v3 = vpop.eup %3110  ;;  %v1132_v47 = vmul.f32 1.442695, %v1070_v12  ;;  %v1308_v13 = vmul.f32 %v3107_v0, %v4797_v33  ;;  %v1314_v56 = vmul.f32 %v3103_v50, %v4798_v6  ;;  %v1224_v16 = vadd.f32 %v1192_v20, %v4271_v62  ;;  %v4801_v62 = vld [vmem:[#allocation24_spill] sm:$0xff]  ;;  %v4807_v6 = vld [vmem:[#allocation15_spill] sm:$0xff] }
 0x13d   :  { %v3113_v19 = vpop.eup %3112  ;;  %v1151_v59 = vsub.f32 1.0, %v3111_v3  ;;  %v1163_v49 = vsub.f32 1.0, %v3109_v35  ;;  %3128 = vpow2.f32 %v1260_v5  ;;  %v1473_v58 = vmul.f32 %v4800_v17, %v1313_v11  ;;  %v1382_v11 = vpop.permute.xlu1 %1381 }
 0x13e   :  { %v3115_v54 = vpop.eup %3114  ;;  %v1468_v53 = vmul.f32 %v1378_v38, %v1308_v13  ;;  %3130 = vpow2.f32 %v1132_v47  ;;  %v1194_v15 = vmul.f32 %v1162_v37, %v4299_v24  ;;  %v1164_v44 = vsub.f32 1.0, %v3113_v19  ;;  %v4803_v38 = vld [vmem:[#allocation33_spill] sm:$0xff]  ;;  %v4804_v37 = vld [vmem:[#allocation26_spill] sm:$0xff]  ;;  %v4806_v13 = vld [vmem:[#allocation36_spill] sm:$0xff] }
 0x13f   :  { %v3117_v9 = vpop.eup %3116  ;;  %v1183_v63 = vmul.f32 %v1151_v59, %v4799_v7  ;;  %v1039_v41 = vmul.f32 0.6931472, %v3115_v54  ;;  %v4451_v0 = vadd.s32 104, %v3442_v57  ;;  %3132 = vpow2.f32 %v1278_v4 }
 0x140   :  { %v3119_v50 = vpop.eup %3118  ;;  %v1225_v20 = vadd.f32 %v1193_v32, %v4801_v62  ;;  %v1474_v3 = vmul.f32 %v4332_v36, %v1314_v56  ;;  %v1280_v27 = vmul.f32 1.442695, %v1224_v16  ;;  %v1195_v5 = vmul.f32 %v1163_v49, %v4803_v38  ;;  %v4468_v16 = vpop.permute.xlu0 %1429  ;;  %v4810_v62 = vld [vmem:[#allocation17_spill] sm:$0xff]  ;;  %v4812_v32 = vld [vmem:[#allocation31_spill] sm:$0xff] }
 0x141   :  { %v1215_v61 = vadd.f32 %v1183_v63, %v4802_v45  ;;  %v1071_v12 = vmul.f32 %v1039_v41, %v839_v40  ;;  %v3121_v35 = vpop.eup %3120  ;;  %v1165_v47 = vsub.f32 1.0, %v3117_v9  ;;  %v1586_v24 = vsel %vm1538_vm12, %v1468_v53, 0.0  ;;  %v4808_v53 = vld [vmem:[#allocation47_spill] sm:$0xff] }
 0x142   :  { %v1309_v19 = vmul.f32 %v3121_v35, %v4804_v37  ;;  %v1591_v40 = vsel %vm1527_vm0, %v1473_v58, 0.0  ;;  %v1226_v59 = vadd.f32 %v1194_v15, %v4806_v13  ;;  %v1196_v36 = vmul.f32 %v1164_v44, %v756_v48  ;;  %v4811_v35 = vld [vmem:[#allocation48_spill] sm:$0xff] }
 0x143   :  { %v1262_v4 = vmul.f32 1.442695, %v1215_v61  ;;  %v1134_v33 = vmul.f32 1.442695, %v1071_v12  ;;  %vm1539_vm13 = vcmp.lt.s32.totalorder %v3749_v10, %v4451_v0  ;;  %v1315_v56 = vmul.f32 %v3119_v50, %v4807_v6 }
 0x144   :  { %v3123_v54 = vpop.eup %3122  ;;  %v1282_v49 = vmul.f32 1.442695, %v1225_v20  ;;  %v1469_v9 = vmul.f32 %v1382_v11, %v1309_v19  ;;  %v1227_v7 = vadd.f32 %v1195_v5, %v4808_v53  ;;  %v1619_v63 = vadd.f32 %v4399_v1, %v1586_v24 }
 0x145   :  { %3134 = vpow2.f32 %v1262_v4  ;;  %v1197_v41 = vmul.f32 %v1165_v47, %v4420_v22  ;;  %v3125_v17 = vpop.eup %3124  ;;  %v677_v48 = vadd.f32 %v4736_v31, %v4403_v25  ;;  %v1592_v15 = vsel %vm1528_vm2, %v1474_v3, 0.0 }
 0x146   :  { %3136 = vpow2.f32 %v1134_v33  ;;  %v1587_v44 = vsel %vm1539_vm13, %v1469_v9, 0.0  ;;  %v1316_v20 = vmul.f32 %v3123_v54, %v4810_v62  ;;  %v1284_v1 = vmul.f32 1.442695, %v1226_v59  ;;  %v4814_v54 = vld [vmem:[#allocation20_spill] sm:$0xff]  ;;  %v4822_v59 = vld [vmem:[#allocation29_spill] sm:$0xff] }
 0x147   :  { %3138 = vpow2.f32 %v1280_v27  ;;  %v3127_v50 = vpop.eup %3126  ;;  %v1228_v22 = vadd.f32 %v1196_v36, %v4424_v29  ;;  %v1620_v45 = vadd.f32 %v1619_v63, %v1587_v44  ;;  %v638_v61 = vmul.f32 %v4733_v55, %v4792_v52  ;;  %v4491_v29 = vpop.permute.xlu0 %1433 }
 0x148   :  { %v718_v25 = vmul.f32 %v4735_v2, %v4792_v52  ;;  %v1629_v12 = vadd.f32 %v1591_v40, %v4436_v18  ;;  %v1475_v3 = vmul.f32 %v4811_v35, %v1315_v56  ;;  %3140 = vpow2.f32 %v1282_v49  ;;  %v1386_v18 = vpop.permute.xlu1 %1385  ;;  %v4815_v49 = vld [vmem:[#allocation23_spill] sm:$0xff] }
 0x149   :  { %v1286_v27 = vmul.f32 1.442695, %v1227_v7  ;;  %v1229_v38 = vadd.f32 %v1197_v41, %v677_v48  ;;  %v719_v11 = vmul.f32 %v4735_v2, %v4794_v60  ;;  %v1476_v37 = vmul.f32 %v4362_v43, %v1316_v20 }
 0x14a   :  { %v3129_v5 = vpop.eup %3128  ;;  %v1630_v47 = vadd.f32 %v1629_v12, %v1592_v15  ;;  %3142 = vpow2.f32 %v1284_v1  ;;  %v1288_v19 = vmul.f32 1.442695, %v1228_v22  ;;  %v4495_v52 = vadd.s32 112, %v3442_v57 }
 0x14b   :  { %v3131_v24 = vpop.eup %3130  ;;  %v678_v4 = vadd.f32 %v4736_v31, %v638_v61  ;;  %v758_v33 = vadd.f32 %v4737_v14, %v718_v25  ;;  %v1310_v40 = vmul.f32 %v3129_v5, %v4812_v32  ;;  %v1593_v36 = vsel %vm1529_vm3, %v1475_v3, 0.0  ;;  %v1438_v58 = vpop.permute.xlu0 %1437  ;;  %v4817_v25 = vld [vmem:[#allocation32_spill] sm:$0xff] }
 0x14c   :  { %v1166_v13 = vsub.f32 1.0, %v3131_v24  ;;  %v3133_v2 = vpop.eup %3132  ;;  %v1317_v43 = vmul.f32 %v3125_v17, %v4814_v54  ;;  %3144 = vpow2.f32 %v1286_v27  ;;  %v1290_v6 = vmul.f32 1.442695, %v1229_v38  ;;  %v1390_v62 = vpop.permute.xlu1 %1389 }
 0x14d   :  { %v1631_v56 = vadd.f32 %v1630_v47, %v1593_v36  ;;  %v1318_v9 = vmul.f32 %v3127_v50, %v4815_v49  ;;  %v1470_v53 = vmul.f32 %v1386_v18, %v1310_v40  ;;  %v1594_v41 = vsel %vm1530_vm4, %v1476_v37, 0.0 }
 0x14e   :  { %v1198_v7 = vmul.f32 %v1166_v13, %v758_v33  ;;  %3146 = vpow2.f32 %v1288_v19  ;;  %vm1540_vm14 = vcmp.lt.s32.totalorder %v3749_v10, %v4495_v52  ;;  %v4511_v48 = vadd.s32 120, %v3442_v57 }
 0x14f   :  { %v639_v44 = vmul.f32 %v4733_v55, %v4794_v60  ;;  %v1477_v50 = vmul.f32 %v4374_v51, %v1317_v43  ;;  %3148 = vpow2.f32 %v1290_v6  ;;  %v1632_v1 = vadd.f32 %v1631_v56, %v1594_v41  ;;  %v4818_v51 = vld [vmem:[#allocation27_spill] sm:$0xff] }
 0x150   :  { %v1230_v17 = vadd.f32 %v1198_v7, %v678_v4  ;;  %v1588_v22 = vsel %vm1540_vm14, %v1470_v53, 0.0  ;;  %v759_v35 = vadd.f32 %v4737_v14, %v719_v11  ;;  %v1478_v3 = vmul.f32 %v4396_v34, %v1318_v9  ;;  %v1442_v11 = vpop.permute.xlu0 %1441  ;;  %v4823_v9 = vld [vmem:[#allocation30_spill] sm:$0xff] }
 0x151   :  { %vm1541_vm15 = vcmp.lt.s32.totalorder %v3749_v10, %v4511_v48  ;;  %v1319_v60 = vmul.f32 %v3133_v2, %v4818_v51  ;;  %v679_v38 = vadd.f32 %v4736_v31, %v639_v44  ;;  %v1595_v47 = vsel %vm1531_vm5, %v1477_v50, 0.0  ;;  %v4821_v31 = vld [vmem:[#allocation28_spill] sm:$0xff] }
 0x152   :  { %v3135_v15 = vpop.eup %3134  ;;  %v1292_v61 = vmul.f32 1.442695, %v1230_v17  ;;  %v1621_v24 = vadd.f32 %v1620_v45, %v1588_v22  ;;  %v1633_v14 = vadd.f32 %v1632_v1, %v1595_v47  ;;  %v1596_v33 = vsel %vm1532_vm6, %v1478_v3, 0.0  ;;  %v4826_v22 = vld [vmem:[#allocation35_spill] sm:$0xff] }
 0x153   :  { %v3137_v20 = vpop.eup %3136  ;;  %v1311_v57 = vmul.f32 %v3135_v15, %v4817_v25  ;;  %v1479_v34 = vmul.f32 %v4427_v26, %v1319_v60  ;;  %v4824_v15 = vld [vmem:[#allocation34_spill] sm:$0xff] }
 0x154   :  { %v3139_v12 = vpop.eup %3138  ;;  %v1167_v55 = vsub.f32 1.0, %v3137_v20  ;;  %3150 = vpow2.f32 %v1292_v61  ;;  %v1634_v6 = vadd.f32 %v1633_v14, %v1596_v33  ;;  %v1446_v41 = vpop.permute.xlu0 %1445 }
 0x155   :  { %v1471_v27 = vmul.f32 %v1390_v62, %v1311_v57  ;;  %v3141_v19 = vpop.eup %3140  ;;  %v1320_v32 = vmul.f32 %v3139_v12, %v4821_v31  ;;  %v1597_v56 = vsel %vm1533_vm7, %v1479_v34, 0.0 }
 0x156   :  { %v1199_v37 = vmul.f32 %v1167_v55, %v759_v35  ;;  %v1321_v36 = vmul.f32 %v3141_v19, %v4822_v59  ;;  %v1635_v28 = vadd.f32 %v1634_v6, %v1597_v56  ;;  %v4827_v35 = vld [vmem:[#allocation57_spill] sm:$0xff] }
 0x157   :  { %v1589_v18 = vsel %vm1541_vm15, %v1471_v27, 0.0  ;;  %v3143_v2 = vpop.eup %3142  ;;  %v1480_v45 = vmul.f32 %v4445_v46, %v1320_v32  ;;  %v1606_v27 = vld [vmem:[#allocation2] sm:$0x1] }
 0x158   :  { %v1622_v40 = vadd.f32 %v1621_v24, %v1589_v18  ;;  %v1231_v13 = vadd.f32 %v1199_v37, %v679_v38  ;;  %v1481_v49 = vmul.f32 %v4468_v16, %v1321_v36  ;;  %v1322_v53 = vmul.f32 %v3143_v2, %v4823_v9  ;;  %v1450_v60 = vpop.permute.xlu0 %1449  ;;  %v1607_v36 = vld [vmem:[#allocation2 + $0x1] sm:$0x1] }
 0x159   :  { %v3145_v43 = vpop.eup %3144  ;;  %v1598_v46 = vsel %vm1534_vm8, %v1480_v45, 0.0 }
 0x15a   :  { %v1623_v54 = vrot.slane %v1622_v40, 4  ;;  %v1294_v26 = vmul.f32 1.442695, %v1231_v13  ;;  %v1482_v17 = vmul.f32 %v4491_v29, %v1322_v53  ;;  %v1323_v44 = vmul.f32 %v3145_v43, %v4824_v15 }
 0x15b   :  { %v3147_v63 = vpop.eup %3146  ;;  %v1599_v16 = vsel %vm1535_vm9, %v1481_v49, 0.0  ;;  %v1636_v57 = vadd.f32 %v1635_v28, %v1598_v46 }
 0x15c   :  { %v1624_v7 = vadd.f32 %v1623_v54, %v1622_v40  ;;  %3152 = vpow2.f32 %v1294_v26  ;;  %v3149_v62 = vpop.eup %3148  ;;  %v1483_v1 = vmul.f32 %v1438_v58, %v1323_v44  ;;  %v1324_v61 = vmul.f32 %v3147_v63, %v4826_v22  ;;  %v1454_v18 = vpop.permute.xlu0 %1453 }
 0x15d   :  { %v1600_v30 = vsel %vm1536_vm10, %v1482_v17, 0.0  ;;  %v1325_v3 = vmul.f32 %v3149_v62, %v4827_v35  ;;  %v1637_v51 = vadd.f32 %v1636_v57, %v1599_v16 }
 0x15e   :  { %v1625_v50 = vrot.slane %v1624_v7, 2  ;;  %v1484_v29 = vmul.f32 %v1442_v11, %v1324_v61  ;;  %v1601_v58 = vsel %vm1537_vm11, %v1483_v1, 0.0 }
 0x15f   :  { %v1485_v38 = vmul.f32 %v1446_v41, %v1325_v3  ;;  %v1638_v24 = vadd.f32 %v1637_v51, %v1600_v30 }
 0x160   :  { %v1626_v25 = vadd.f32 %v1625_v50, %v1624_v7  ;;  %v1602_v39 = vsel %vm1538_vm12, %v1484_v29, 0.0 }
 0x161   :  { %v3151_v12 = vpop.eup %3150  ;;  %v1639_v14 = vadd.f32 %v1638_v24, %v1601_v58  ;;  %v1603_v34 = vsel %vm1539_vm13, %v1485_v38, 0.0 }
 0x162   :  { %v1627_v55 = vrot.slane %v1626_v25, 1  ;;  %v1326_v5 = vmul.f32 %v3151_v12, %v4359_v21 }
 0x163   :  { %v1640_v23 = vadd.f32 %v1639_v14, %v1602_v39 }
 0x164   :  { %v1628_v47 = vadd.f32 %v1627_v55, %v1626_v25  ;;  %v1486_v37 = vmul.f32 %v1450_v60, %v1326_v5 }
 0x165   :  { %v1641_v33 = vadd.f32 %v1640_v23, %v1603_v34 }
 0x166   :  { %v1650_v19 = vadd.f32 %v1628_v47, %v1606_v27  ;;  %v1604_v21 = vsel %vm1540_vm14, %v1486_v37, 0.0 }
 0x167   :  { %v1642_v31 = vadd.f32 %v1641_v33, %v1604_v21 }
 0x168   :  { %1652 = vst [vmem:[#allocation2] sm:$0x1] %v1650_v19 }
 0x169   :  { %v3153_v11 = vpop.eup %3152 }
 0x16a   :  { %v1327_v4 = vmul.f32 %v3153_v11, %v4377_v8 }
 0x16c   :  { %v1487_v42 = vmul.f32 %v1454_v18, %v1327_v4 }
 0x16e   :  { %v1605_v32 = vsel %vm1541_vm15, %v1487_v42, 0.0 }
 0x16f   :  { %v1643_v40 = vadd.f32 %v1642_v31, %v1605_v32 }
 0x171   :  { %v1644_v0 = vrot.slane %v1643_v40, 4 }
 0x173   :  { %v1645_v13 = vadd.f32 %v1644_v0, %v1643_v40 }
 0x175   :  { %v1646_v2 = vrot.slane %v1645_v13, 2 }
 0x177   :  { %v1647_v45 = vadd.f32 %v1646_v2, %v1645_v13 }
 0x179   :  { %v1648_v59 = vrot.slane %v1647_v45, 1 }
 0x17b   :  { %v1649_v54 = vadd.f32 %v1648_v59, %v1647_v45 }
 0x17d   :  { %v1651_v26 = vadd.f32 %v1649_v54, %v1607_v36 }
 0x17f   :  { %1653 = vst [vmem:[#allocation2 + $0x1] sm:$0x1] %v1651_v26 }
 0x180 PF:  { %v2835_v52 = vld [vmem:[#allocation2] sm:$0x1]  ;;  %vm2837_vm0 = vcmask 1040384   ;;  %vm2846_vm1 = vcmask 0  }
 0x181   :  { %v2838_v43 = vsel %vm2837_vm0, %v2835_v52, 0.0 }
 0x182   :  { %2839 = vadd.xlane.f32.xlu0 %v2838_v43 }
 0x186   :  { %v2836_v8 = vld [vmem:[#allocation2 + $0x1] sm:$0x1] }
 0x187   :  { %v2841_v6 = vsel %vm2837_vm0, %v2836_v8, 0.0 }
 0x188   :  { %2842 = vadd.xlane.f32.xlu0 %v2841_v6 }
 0x20b   :  { %v2840_v10 = vpop.xlane.xlu0 %2839 }
 0x20c   :  { %v2844_v48 = vsub.f32 0.0, %v2840_v10 }
 0x20e   :  { %2847 = vst.msk [vmem:[%s4585_s5] sm:$0x1] %vm2846_vm1, %v2844_v48 }
 0x211   :  { %v2843_v56 = vpop.xlane.xlu0 %2842 }
 0x212   :  { %v2845_v49 = vsub.f32 0.0, %v2843_v56 }
 0x214   :  { %2848 = vst.msk [vmem:[%s4585_s5 + $0x1] sm:$0x1] %vm2846_vm1, %v2845_v49 }
 0x215   :  { %2865 = vsyncpa [#allocation6], 1 }

</bundles_post_ra>
